<compile_context>
chip_gen: v7x
topology: tpu7x:2x2x1
jax: 0.10.0
libtpu: 0.0.40
codegen_flags: <defaults>
</compile_context>

<pallas_src>
import functools

import numpy as np
import jax
import jax.numpy as jnp
from jax.experimental import pallas as pl
from jax.experimental.pallas import tpu as pltpu

H = W = 16             # spatial size
HW = H * W             # 256 -> dense multiple of 128 lanes
C_IN = 3               # RGB input channels
C1 = 8                 # hidden channels of each synthetic "UNet"
N_MODELS = 3           # ensemble size
MEAN = 0.485
STD = 0.229

CP_IN = 8              # padded input rows (3 image + 1 ones + 4 zero)
ONES_IN = 3            # ones row inside the padded input
FP = 32                # feature rows: 3 members x 8 channels + ones + pad
ONES_F = 24            # ones row inside the feature block
OFFSETS = [(dy, dx) for dy in range(3) for dx in range(3)]
CENTER = 4             # index of (dy=1, dx=1) in OFFSETS


# ----------------------------------------------------------------------------
# Trace-time constants (built once with numpy, never re-built per call).
# ----------------------------------------------------------------------------
def _build_masks():
    """(9*FP, HW) per-tap validity masks for SAME zero-padding."""
    yy, xx = np.divmod(np.arange(HW, dtype=np.int64), W)
    m = np.zeros((9 * FP, HW), np.float32)
    for i, (dy, dx) in enumerate(OFFSETS):
        ok = ((yy + dy - 1 >= 0) & (yy + dy - 1 < H) &
              (xx + dx - 1 >= 0) & (xx + dx - 1 < W))
        m[i * FP:(i + 1) * FP, :] = ok.astype(np.float32)[None, :]
    return m


MASKS = jnp.asarray(_build_masks())                       # (288, 256) f32

_x_tail = np.zeros((CP_IN - C_IN, HW), np.float32)
_x_tail[ONES_IN - C_IN, :] = 1.0                          # ones row (row 3)
_X_TAIL = jnp.asarray(_x_tail)                            # (5, 256) f32


# ----------------------------------------------------------------------------
# One-time parameter packing (NOT on the per-call path).
# ----------------------------------------------------------------------------
def pack_params(params, normalize=False):
    """Pack per-member HWIO conv weights into block-diagonal im2col matrices.

    Returns (w1b, w23b):
      w1b  : (FP, 9*CP_IN) = (32, 72)   conv1 for all members, scale/normalize
                                        and bias folded in (ones-row trick)
      w23b : (FP+8, 9*FP)  = (40, 288)  rows 0..31 conv2 (block-diag, bias
                                        folded), row 32 = ensemble-mean head
    """
    w1, b1, w2, b2, w3, b3 = (np.asarray(p, dtype=np.float32) for p in params)
    s = 1.0 / (255.0 * STD) if normalize else 1.0 / 255.0
    m_add = (-MEAN / STD) if normalize else 0.0

    w1b = np.zeros((FP, 9 * CP_IN), np.float32)
    w23b = np.zeros((FP + 8, 9 * FP), np.float32)

    for i, (dy, dx) in enumerate(OFFSETS):
        for m in range(N_MODELS):
            rows = slice(m * C1, (m + 1) * C1)
            # conv1: scale folded into weights, additive normalize term on the
            # ones row (mask-gated like the image taps -> SAME padding exact).
            blk1 = w1[m, dy, dx]                           # (C_IN, C1)
            w1b[rows, i * CP_IN:i * CP_IN + C_IN] = blk1.T * s
            w1b[rows, i * CP_IN + ONES_IN] = m_add * blk1.sum(axis=0)
            # conv2: block-diagonal over members.
            blk2 = w2[m, dy, dx]                           # (C1, C1)
            w23b[rows, i * FP + m * C1:i * FP + (m + 1) * C1] = blk2.T
            # head: ensemble mean folded in (row FP of the slab).
            blk3 = w3[m, dy, dx, :, 0]                     # (C1,)
            w23b[FP, i * FP + m * C1:i * FP + (m + 1) * C1] = blk3 / N_MODELS

    # Biases ride on the ones row at the (always in-image) center tap.
    for m in range(N_MODELS):
        rows = slice(m * C1, (m + 1) * C1)
        w1b[rows, CENTER * CP_IN + ONES_IN] += b1[m, 0]
        w23b[rows, CENTER * FP + ONES_F] += b2[m, 0]
        w23b[FP, CENTER * FP + ONES_F] += b3[m, 0, 0] / N_MODELS

    # Ones-carrier: conv1 row ONES_F outputs the constant 1 so conv2/conv3 can
    # reuse it as their bias channel (conv2 row ONES_F stays 0, residual keeps
    # it at 1 in f2).
    w1b[ONES_F, CENTER * CP_IN + ONES_IN] = 1.0

    return jnp.asarray(w1b), jnp.asarray(w23b)


# ----------------------------------------------------------------------------
# Kernel: single invocation, whole ensemble, 3 MXU matmuls.
# ----------------------------------------------------------------------------
def _ensemble_kernel(x_ref, masks_ref, w1_ref, w23_ref, out_ref):
    def im2col(feat, rows):
        # feat: (rows, HW) spatial-on-lanes; returns (9*rows, HW) col.
        taps = []
        for i, (dy, dx) in enumerate(OFFSETS):
            off = (dy - 1) * W + (dx - 1)
            if off == 0:
                taps.append(feat)                          # center, never masked
            else:
                t = pltpu.roll(feat, shift=(-off) % HW, axis=1)   # XLU rotate
                taps.append(t * masks_ref[i * FP:i * FP + rows, :])
        return jnp.concatenate(taps, axis=0)

    x = x_ref[...]                                         # (8, HW) raw + ones
    col1 = im2col(x, CP_IN)                                # (72, HW)
    f1 = jnp.maximum(
        jnp.dot(w1_ref[...], col1, preferred_element_type=jnp.float32), 0.0)

    col2 = im2col(f1, FP)                                  # (288, HW)
    f2 = jnp.maximum(
        jnp.dot(w23_ref[0:FP, :], col2,
                preferred_element_type=jnp.float32), 0.0) + f1

    col3 = im2col(f2, FP)                                  # (288, HW)
    # Row 0 of the head output is already the ensemble mean.
    out_ref[...] = jnp.dot(w23_ref[FP:FP + 8, :], col3,
                           preferred_element_type=jnp.float32)


_VMEM = pl.BlockSpec(memory_space=pltpu.MemorySpace.VMEM)


@jax.jit
def _forward_jit(image_chw, w1b, w23b, masks):
    x = jnp.concatenate(
        [image_chw.reshape(C_IN, HW).astype(jnp.float32), _X_TAIL], axis=0)
    out = pl.pallas_call(
        _ensemble_kernel,
        out_shape=jax.ShapeDtypeStruct((8, HW), jnp.float32),
        in_specs=[_VMEM, _VMEM, _VMEM, _VMEM],
        out_specs=_VMEM,
    )(x, masks, w1b, w23b)
    return out[0].reshape(H, W)


def unet_ensemble_forward(image_chw, packed):
    """image_chw: (C_IN, H, W) uint8-valued float image (torch-style CHW)."""
    w1b, w23b = packed
    return _forward_jit(image_chw, w1b, w23b, MASKS)


# ----------------------------------------------------------------------------
# Parameter init + pure-JAX reference.
# ----------------------------------------------------------------------------
def init_params(key):
    k = jax.random.split(key, 6)
    w1 = jax.random.normal(k[0], (N_MODELS, 3, 3, C_IN, C1), jnp.float32) * 0.20
    b1 = jax.random.normal(k[1], (N_MODELS, 1, C1), jnp.float32) * 0.05
    w2 = jax.random.normal(k[2], (N_MODELS, 3, 3, C1, C1), jnp.float32) * 0.10
    b2 = jax.random.normal(k[3], (N_MODELS, 1, C1), jnp.float32) * 0.05
    w3 = jax.random.normal(k[4], (N_MODELS, 3, 3, C1, 1), jnp.float32) * 0.10
    b3 = jax.random.normal(k[5], (N_MODELS, 1, 1), jnp.float32) * 0.05
    return w1, b1, w2, b2, w3, b3


def reference_forward(image_chw, params, normalize=False):
    x = jnp.transpose(image_chw, (1, 2, 0)).astype(jnp.float32) / 255.0
    if normalize:
        x = (x - MEAN) / STD
    w1, b1, w2, b2, w3, b3 = params

    def conv(x, w, b):
        y = jax.lax.conv_general_dilated(
            x[None], w, (1, 1), "SAME",
            dimension_numbers=("NHWC", "HWIO", "NHWC"))[0]
        return y + b

    preds = []
    for m in range(N_MODELS):
        f1 = jnp.maximum(conv(x, w1[m], b1[m]), 0.0)
        f2 = jnp.maximum(conv(f1, w2[m], b2[m]), 0.0) + f1
        preds.append(conv(f2, w3[m], b3[m])[..., 0])
    return jnp.mean(jnp.stack(preds), axis=0)


if __name__ == "__main__":
    key = jax.random.PRNGKey(0)
    k_img, k_par = jax.random.split(key)

    # uint8-valued image, torch-style CHW
    image = jnp.floor(jax.random.uniform(k_img, (C_IN, H, W), jnp.float32) * 256.0)
    image = jnp.clip(image, 0.0, 255.0)

    params = init_params(k_par)

    for normalize in (False, True):
        packed = pack_params(params, normalize=normalize)   # one-time packing
        out = jax.block_until_ready(unet_ensemble_forward(image, packed))
        ref = reference_forward(image, params, normalize=normalize)
        assert out.shape == (H, W), out.shape
        if not jnp.allclose(out, ref, atol=1e-3, rtol=1e-3):
            raise AssertionError(
                f"Pallas result mismatches JAX reference (normalize={normalize})")

    print("KERNEL_OK")
</pallas_src>

<mosaic_0001>
module attributes {stable_mosaic.version = 11 : i64} {
  func.func @_ensemble_kernel(%arg0: memref<8x256xf32, #tpu.memory_space<vmem>>, %arg1: memref<288x256xf32, #tpu.memory_space<vmem>>, %arg2: memref<32x72xf32, #tpu.memory_space<vmem>>, %arg3: memref<40x288xf32, #tpu.memory_space<vmem>>, %arg4: memref<8x256xf32, #tpu.memory_space<vmem>>) attributes {dimension_semantics = [], scalar_prefetch = 0 : i64, scratch_operands = 0 : i64, tpu.core_type = #tpu.core_type<tc>} {
    %c0 = arith.constant 0 : index
    %c0_0 = arith.constant 0 : index
    %0 = vector.load %arg0[%c0, %c0_0] : memref<8x256xf32, #tpu.memory_space<vmem>>, vector<8x256xf32>
    %c17_i32 = arith.constant 17 : i32
    %1 = tpu.dynamic_rotate %0 by %c17_i32 dim 1 : vector<8x256xf32>, i32 -> vector<8x256xf32>
    %c0_1 = arith.constant 0 : index
    %c0_2 = arith.constant 0 : index
    %2 = vector.load %arg1[%c0_1, %c0_2] : memref<288x256xf32, #tpu.memory_space<vmem>>, vector<8x256xf32>
    %3 = arith.mulf %1, %2 : vector<8x256xf32>
    %c16_i32 = arith.constant 16 : i32
    %4 = tpu.dynamic_rotate %0 by %c16_i32 dim 1 : vector<8x256xf32>, i32 -> vector<8x256xf32>
    %c32 = arith.constant 32 : index
    %c0_3 = arith.constant 0 : index
    %5 = vector.load %arg1[%c32, %c0_3] : memref<288x256xf32, #tpu.memory_space<vmem>>, vector<8x256xf32>
    %6 = arith.mulf %4, %5 : vector<8x256xf32>
    %c15_i32 = arith.constant 15 : i32
    %7 = tpu.dynamic_rotate %0 by %c15_i32 dim 1 : vector<8x256xf32>, i32 -> vector<8x256xf32>
    %c64 = arith.constant 64 : index
    %c0_4 = arith.constant 0 : index
    %8 = vector.load %arg1[%c64, %c0_4] : memref<288x256xf32, #tpu.memory_space<vmem>>, vector<8x256xf32>
    %9 = arith.mulf %7, %8 : vector<8x256xf32>
    %c1_i32 = arith.constant 1 : i32
    %10 = tpu.dynamic_rotate %0 by %c1_i32 dim 1 : vector<8x256xf32>, i32 -> vector<8x256xf32>
    %c96 = arith.constant 96 : index
    %c0_5 = arith.constant 0 : index
    %11 = vector.load %arg1[%c96, %c0_5] : memref<288x256xf32, #tpu.memory_space<vmem>>, vector<8x256xf32>
    %12 = arith.mulf %10, %11 : vector<8x256xf32>
    %c255_i32 = arith.constant 255 : i32
    %13 = tpu.dynamic_rotate %0 by %c255_i32 dim 1 : vector<8x256xf32>, i32 -> vector<8x256xf32>
    %c160 = arith.constant 160 : index
    %c0_6 = arith.constant 0 : index
    %14 = vector.load %arg1[%c160, %c0_6] : memref<288x256xf32, #tpu.memory_space<vmem>>, vector<8x256xf32>
    %15 = arith.mulf %13, %14 : vector<8x256xf32>
    %c241_i32 = arith.constant 241 : i32
    %16 = tpu.dynamic_rotate %0 by %c241_i32 dim 1 : vector<8x256xf32>, i32 -> vector<8x256xf32>
    %c192 = arith.constant 192 : index
    %c0_7 = arith.constant 0 : index
    %17 = vector.load %arg1[%c192, %c0_7] : memref<288x256xf32, #tpu.memory_space<vmem>>, vector<8x256xf32>
    %18 = arith.mulf %16, %17 : vector<8x256xf32>
    %c240_i32 = arith.constant 240 : i32
    %19 = tpu.dynamic_rotate %0 by %c240_i32 dim 1 : vector<8x256xf32>, i32 -> vector<8x256xf32>
    %c224 = arith.constant 224 : index
    %c0_8 = arith.constant 0 : index
    %20 = vector.load %arg1[%c224, %c0_8] : memref<288x256xf32, #tpu.memory_space<vmem>>, vector<8x256xf32>
    %21 = arith.mulf %19, %20 : vector<8x256xf32>
    %c239_i32 = arith.constant 239 : i32
    %22 = tpu.dynamic_rotate %0 by %c239_i32 dim 1 : vector<8x256xf32>, i32 -> vector<8x256xf32>
    %c256 = arith.constant 256 : index
    %c0_9 = arith.constant 0 : index
    %23 = vector.load %arg1[%c256, %c0_9] : memref<288x256xf32, #tpu.memory_space<vmem>>, vector<8x256xf32>
    %24 = arith.mulf %22, %23 : vector<8x256xf32>
    %25 = tpu.concatenate %3, %6, %9, %12, %0, %15, %18, %21, %24 in 0 : vector<8x256xf32>, vector<8x256xf32>, vector<8x256xf32>, vector<8x256xf32>, vector<8x256xf32>, vector<8x256xf32>, vector<8x256xf32>, vector<8x256xf32>, vector<8x256xf32> -> vector<72x256xf32>
    %c0_10 = arith.constant 0 : index
    %c0_11 = arith.constant 0 : index
    %26 = vector.load %arg2[%c0_10, %c0_11] : memref<32x72xf32, #tpu.memory_space<vmem>>, vector<32x72xf32>
    %cst = arith.constant dense<0.000000e+00> : vector<32x256xf32>
    %27 = tpu.matmul %26, %25, %cst {dimension_numbers = #tpu.dot_dimension_numbers<[1], [0], [0], [1], [0, 0, 1, 1], [], []>} : vector<32x72xf32>, vector<72x256xf32>, vector<32x256xf32> -> vector<32x256xf32>
    %cst_12 = arith.constant 0.000000e+00 : f32
    %28 = vector.broadcast %cst_12 : f32 to vector<32x256xf32>
    %29 = arith.maximumf %27, %28 : vector<32x256xf32>
    %c17_i32_13 = arith.constant 17 : i32
    %30 = tpu.dynamic_rotate %29 by %c17_i32_13 dim 1 : vector<32x256xf32>, i32 -> vector<32x256xf32>
    %c0_14 = arith.constant 0 : index
    %c0_15 = arith.constant 0 : index
    %31 = vector.load %arg1[%c0_14, %c0_15] : memref<288x256xf32, #tpu.memory_space<vmem>>, vector<32x256xf32>
    %32 = arith.mulf %30, %31 : vector<32x256xf32>
    %c16_i32_16 = arith.constant 16 : i32
    %33 = tpu.dynamic_rotate %29 by %c16_i32_16 dim 1 : vector<32x256xf32>, i32 -> vector<32x256xf32>
    %c32_17 = arith.constant 32 : index
    %c0_18 = arith.constant 0 : index
    %34 = vector.load %arg1[%c32_17, %c0_18] : memref<288x256xf32, #tpu.memory_space<vmem>>, vector<32x256xf32>
    %35 = arith.mulf %33, %34 : vector<32x256xf32>
    %c15_i32_19 = arith.constant 15 : i32
    %36 = tpu.dynamic_rotate %29 by %c15_i32_19 dim 1 : vector<32x256xf32>, i32 -> vector<32x256xf32>
    %c64_20 = arith.constant 64 : index
    %c0_21 = arith.constant 0 : index
    %37 = vector.load %arg1[%c64_20, %c0_21] : memref<288x256xf32, #tpu.memory_space<vmem>>, vector<32x256xf32>
    %38 = arith.mulf %36, %37 : vector<32x256xf32>
    %c1_i32_22 = arith.constant 1 : i32
    %39 = tpu.dynamic_rotate %29 by %c1_i32_22 dim 1 : vector<32x256xf32>, i32 -> vector<32x256xf32>
    %c96_23 = arith.constant 96 : index
    %c0_24 = arith.constant 0 : index
    %40 = vector.load %arg1[%c96_23, %c0_24] : memref<288x256xf32, #tpu.memory_space<vmem>>, vector<32x256xf32>
    %41 = arith.mulf %39, %40 : vector<32x256xf32>
    %c255_i32_25 = arith.constant 255 : i32
    %42 = tpu.dynamic_rotate %29 by %c255_i32_25 dim 1 : vector<32x256xf32>, i32 -> vector<32x256xf32>
    %c160_26 = arith.constant 160 : index
    %c0_27 = arith.constant 0 : index
    %43 = vector.load %arg1[%c160_26, %c0_27] : memref<288x256xf32, #tpu.memory_space<vmem>>, vector<32x256xf32>
    %44 = arith.mulf %42, %43 : vector<32x256xf32>
    %c241_i32_28 = arith.constant 241 : i32
    %45 = tpu.dynamic_rotate %29 by %c241_i32_28 dim 1 : vector<32x256xf32>, i32 -> vector<32x256xf32>
    %c192_29 = arith.constant 192 : index
    %c0_30 = arith.constant 0 : index
    %46 = vector.load %arg1[%c192_29, %c0_30] : memref<288x256xf32, #tpu.memory_space<vmem>>, vector<32x256xf32>
    %47 = arith.mulf %45, %46 : vector<32x256xf32>
    %c240_i32_31 = arith.constant 240 : i32
    %48 = tpu.dynamic_rotate %29 by %c240_i32_31 dim 1 : vector<32x256xf32>, i32 -> vector<32x256xf32>
    %c224_32 = arith.constant 224 : index
    %c0_33 = arith.constant 0 : index
    %49 = vector.load %arg1[%c224_32, %c0_33] : memref<288x256xf32, #tpu.memory_space<vmem>>, vector<32x256xf32>
    %50 = arith.mulf %48, %49 : vector<32x256xf32>
    %c239_i32_34 = arith.constant 239 : i32
    %51 = tpu.dynamic_rotate %29 by %c239_i32_34 dim 1 : vector<32x256xf32>, i32 -> vector<32x256xf32>
    %c256_35 = arith.constant 256 : index
    %c0_36 = arith.constant 0 : index
    %52 = vector.load %arg1[%c256_35, %c0_36] : memref<288x256xf32, #tpu.memory_space<vmem>>, vector<32x256xf32>
    %53 = arith.mulf %51, %52 : vector<32x256xf32>
    %54 = tpu.concatenate %32, %35, %38, %41, %29, %44, %47, %50, %53 in 0 : vector<32x256xf32>, vector<32x256xf32>, vector<32x256xf32>, vector<32x256xf32>, vector<32x256xf32>, vector<32x256xf32>, vector<32x256xf32>, vector<32x256xf32>, vector<32x256xf32> -> vector<288x256xf32>
    %c0_37 = arith.constant 0 : index
    %c0_38 = arith.constant 0 : index
    %55 = vector.load %arg3[%c0_37, %c0_38] : memref<40x288xf32, #tpu.memory_space<vmem>>, vector<32x288xf32>
    %cst_39 = arith.constant dense<0.000000e+00> : vector<32x256xf32>
    %56 = tpu.matmul %55, %54, %cst_39 {dimension_numbers = #tpu.dot_dimension_numbers<[1], [0], [0], [1], [0, 0, 1, 1], [], []>} : vector<32x288xf32>, vector<288x256xf32>, vector<32x256xf32> -> vector<32x256xf32>
    %cst_40 = arith.constant 0.000000e+00 : f32
    %57 = vector.broadcast %cst_40 : f32 to vector<32x256xf32>
    %58 = arith.maximumf %56, %57 : vector<32x256xf32>
    %59 = arith.addf %58, %29 : vector<32x256xf32>
    %c17_i32_41 = arith.constant 17 : i32
    %60 = tpu.dynamic_rotate %59 by %c17_i32_41 dim 1 : vector<32x256xf32>, i32 -> vector<32x256xf32>
    %c0_42 = arith.constant 0 : index
    %c0_43 = arith.constant 0 : index
    %61 = vector.load %arg1[%c0_42, %c0_43] : memref<288x256xf32, #tpu.memory_space<vmem>>, vector<32x256xf32>
    %62 = arith.mulf %60, %61 : vector<32x256xf32>
    %c16_i32_44 = arith.constant 16 : i32
    %63 = tpu.dynamic_rotate %59 by %c16_i32_44 dim 1 : vector<32x256xf32>, i32 -> vector<32x256xf32>
    %c32_45 = arith.constant 32 : index
    %c0_46 = arith.constant 0 : index
    %64 = vector.load %arg1[%c32_45, %c0_46] : memref<288x256xf32, #tpu.memory_space<vmem>>, vector<32x256xf32>
    %65 = arith.mulf %63, %64 : vector<32x256xf32>
    %c15_i32_47 = arith.constant 15 : i32
    %66 = tpu.dynamic_rotate %59 by %c15_i32_47 dim 1 : vector<32x256xf32>, i32 -> vector<32x256xf32>
    %c64_48 = arith.constant 64 : index
    %c0_49 = arith.constant 0 : index
    %67 = vector.load %arg1[%c64_48, %c0_49] : memref<288x256xf32, #tpu.memory_space<vmem>>, vector<32x256xf32>
    %68 = arith.mulf %66, %67 : vector<32x256xf32>
    %c1_i32_50 = arith.constant 1 : i32
    %69 = tpu.dynamic_rotate %59 by %c1_i32_50 dim 1 : vector<32x256xf32>, i32 -> vector<32x256xf32>
    %c96_51 = arith.constant 96 : index
    %c0_52 = arith.constant 0 : index
    %70 = vector.load %arg1[%c96_51, %c0_52] : memref<288x256xf32, #tpu.memory_space<vmem>>, vector<32x256xf32>
    %71 = arith.mulf %69, %70 : vector<32x256xf32>
    %c255_i32_53 = arith.constant 255 : i32
    %72 = tpu.dynamic_rotate %59 by %c255_i32_53 dim 1 : vector<32x256xf32>, i32 -> vector<32x256xf32>
    %c160_54 = arith.constant 160 : index
    %c0_55 = arith.constant 0 : index
    %73 = vector.load %arg1[%c160_54, %c0_55] : memref<288x256xf32, #tpu.memory_space<vmem>>, vector<32x256xf32>
    %74 = arith.mulf %72, %73 : vector<32x256xf32>
    %c241_i32_56 = arith.constant 241 : i32
    %75 = tpu.dynamic_rotate %59 by %c241_i32_56 dim 1 : vector<32x256xf32>, i32 -> vector<32x256xf32>
    %c192_57 = arith.constant 192 : index
    %c0_58 = arith.constant 0 : index
    %76 = vector.load %arg1[%c192_57, %c0_58] : memref<288x256xf32, #tpu.memory_space<vmem>>, vector<32x256xf32>
    %77 = arith.mulf %75, %76 : vector<32x256xf32>
    %c240_i32_59 = arith.constant 240 : i32
    %78 = tpu.dynamic_rotate %59 by %c240_i32_59 dim 1 : vector<32x256xf32>, i32 -> vector<32x256xf32>
    %c224_60 = arith.constant 224 : index
    %c0_61 = arith.constant 0 : index
    %79 = vector.load %arg1[%c224_60, %c0_61] : memref<288x256xf32, #tpu.memory_space<vmem>>, vector<32x256xf32>
    %80 = arith.mulf %78, %79 : vector<32x256xf32>
    %c239_i32_62 = arith.constant 239 : i32
    %81 = tpu.dynamic_rotate %59 by %c239_i32_62 dim 1 : vector<32x256xf32>, i32 -> vector<32x256xf32>
    %c256_63 = arith.constant 256 : index
    %c0_64 = arith.constant 0 : index
    %82 = vector.load %arg1[%c256_63, %c0_64] : memref<288x256xf32, #tpu.memory_space<vmem>>, vector<32x256xf32>
    %83 = arith.mulf %81, %82 : vector<32x256xf32>
    %84 = tpu.concatenate %62, %65, %68, %71, %59, %74, %77, %80, %83 in 0 : vector<32x256xf32>, vector<32x256xf32>, vector<32x256xf32>, vector<32x256xf32>, vector<32x256xf32>, vector<32x256xf32>, vector<32x256xf32>, vector<32x256xf32>, vector<32x256xf32> -> vector<288x256xf32>
    %c32_65 = arith.constant 32 : index
    %c0_66 = arith.constant 0 : index
    %85 = vector.load %arg3[%c32_65, %c0_66] : memref<40x288xf32, #tpu.memory_space<vmem>>, vector<8x288xf32>
    %cst_67 = arith.constant dense<0.000000e+00> : vector<8x256xf32>
    %86 = tpu.matmul %85, %84, %cst_67 {dimension_numbers = #tpu.dot_dimension_numbers<[1], [0], [0], [1], [0, 0, 1, 1], [], []>} : vector<8x288xf32>, vector<288x256xf32>, vector<8x256xf32> -> vector<8x256xf32>
    %c0_68 = arith.constant 0 : index
    %c0_69 = arith.constant 0 : index
    %87 = vector.load %arg4[%c0_68, %c0_69] : memref<8x256xf32, #tpu.memory_space<vmem>>, vector<8x256xf32>
    tpu.vector_store %arg4[%c0_68, %c0_69], %86 {strides = array<i32>} : memref<8x256xf32, #tpu.memory_space<vmem>>, vector<8x256xf32>,
    return
  }
}

</mosaic_0001>

<bundles_post_ra>
// kernel: squeeze.1
= control target key start
LH: loop header
LB: loop body
LE: loop exit
PB: predicated region body
PF: predicated region fallthrough
CT: control target
= control target key end

     0   :  { %s135_s0 = inlined_call_operand.vmem [shape: f32[256], index: 0, kind: input, shape index: {}]   ;;  %s136_s1 = inlined_call_operand.hbm [shape: f32[16,16], index: 1, kind: output, shape index: {}]  }
   0x1   :  { %v5_v0 = vld [vmem:[%s135_s0] sm:$0x3] }
   0x2   :  { %6 = vst [vmem:[#allocation2] sm:$0x3] %v5_v0 }
   0x3   :  { %2 = vsyncpa [#allocation1], 0  ;;  %s94_s0 = smov 112   ;;  %s95_s8 = smov 80   ;;  %vm8_vm0 = vcmask 130048  }
   0x4   :  { %s96_s9 = smov 96   ;;  %s97_s10 = smov 64  }
   0x5   :  { %s98_s11 = smov 48   ;;  %s99_s12 = smov 32  }
   0x6   :  { %s100_s13 = smov 16   ;;  %s101_s14 = smov [#allocation0]  }
   0x7   :  { %s56_s15 = sshll.u32 %s101_s14, 4  ;;  %s57_s15 = int_to_ptr.vmem [resolvable:$true] %s56_s15 }
   0x8   :  { %s70_s16 = scalar_lea.vmem %s57_s15, 256  ;;  %p75_p1 = scmp.lt.s32.totalorder %s57_s15, %s57_s15 }
   0x9   :  { %v10_v1 = vld [vmem:[#allocation2] sm:$0x3]   ;;  %p71_p0 = scmp.ne.s32.totalorder %s57_s15, %s70_s16  ;;  %p76_p2 = scmp.lt.s32.totalorder %s70_s16, %s70_s16 }
   0xa   :  { %v22_v2 = vld [vmem:[#allocation2] sm:$0x3]   ;;  %11 = vrot.lane.b32.xlu0 %v10_v1, %s94_s0 }
   0xb   :  { %23 = vrot.lane.b32.xlu1 %v22_v2, %s95_s8  ;;  %v16_v3 = vld [vmem:[#allocation2] sm:$0x3]   ;;  %p77_p3 = por %p76_p2, %p75_p1 }
   0xc   :  { %v28_v4 = vld [vmem:[#allocation2] sm:$0x3]  }
   0xd   :  { %v7_v5 = vld [vmem:[#allocation2] sm:$0x3]   ;;  %p78_p4 = pnand %p77_p3, %p71_p0 }
   0xe   :  { %9 = vst.msk [vmem:[#allocation0] ss:$8 sm:$0x3] %vm8_vm0, %v7_v5   ;;  %17 = vrot.lane.b32.xlu0 %v16_v3, %s96_s9  ;;  %v34_v6 = vld [vmem:[#allocation2] sm:$0x3]  }
   0xf   :  { %29 = vrot.lane.b32.xlu1 %v28_v4, %s97_s10  ;;  %v40_v7 = vld [vmem:[#allocation2] sm:$0x3]  }
  0x10   :  { %v46_v8 = vld [vmem:[#allocation2] sm:$0x3]  }
  0x12   :  { %35 = vrot.lane.b32.xlu0 %v34_v6, %s98_s11 }
  0x13   :  { %41 = vrot.lane.b32.xlu1 %v40_v7, %s99_s12 }
  0x16   :  { %47 = vrot.lane.b32.xlu0 %v46_v8, %s100_s13 }
  0x7c   :  { %v12_v9 = vpop.permute.xlu0 %11  }
  0x7d   :  { %v24_v10 = vpop.permute.xlu1 %23   ;;  %15 = vst.msk [vmem:[#allocation0 + $0x1] ss:$8 sm:$0x3] %vm8_vm0, %v12_v9  }
  0x7e   :  { %27 = vst.msk [vmem:[#allocation0 + $0x3] ss:$8 sm:$0x3] %vm8_vm0, %v24_v10  }
  0x80   :  { %v18_v11 = vpop.permute.xlu0 %17  }
  0x81   :  { %v30_v12 = vpop.permute.xlu1 %29   ;;  %21 = vst.msk [vmem:[#allocation0 + $0x2] ss:$8 sm:$0x3] %vm8_vm0, %v18_v11  }
  0x82   :  { %33 = vst.msk [vmem:[#allocation0 + $0x4] ss:$8 sm:$0x3] %vm8_vm0, %v30_v12  }
  0x84   :  { %v36_v13 = vpop.permute.xlu0 %35  }
  0x85   :  { %v42_v14 = vpop.permute.xlu1 %41   ;;  %39 = vst.msk [vmem:[#allocation0 + $0x5] ss:$8 sm:$0x3] %vm8_vm0, %v36_v13  }
  0x86   :  { %45 = vst.msk [vmem:[#allocation0 + $0x6] ss:$8 sm:$0x3] %vm8_vm0, %v42_v14  }
  0x88   :  { %v48_v15 = vpop.permute.xlu0 %47  }
  0x89   :  { %51 = vst.msk [vmem:[#allocation0 + $0x7] ss:$8 sm:$0x3] %vm8_vm0, %v48_v15  }
  0x8a   :  { %81 = shalt.err (!%p78_p4)
}
  0x8b   :  { %s82_s19 = scalar_lea.hbm %s136_s1, 256 }
  0x8c   :  { %p83_p5 = scmp.ne.s32.totalorder %s136_s1, %s82_s19  ;;  %p86_p6 = scmp.lt.u32.totalorder %s82_s19, %s136_s1 }
  0x8e   :  { %p88_p7 = pnand %p86_p6, %p83_p5 }
  0x90   :  { %91 = shalt.err (!%p88_p7)
}
  0x91   :  { %59 = dma.vmem_to_hbm [thread:$0]  %s57_s15, 256, %s136_s1, [#allocation1]  }
  0x92   :  { %92 = dma.done.wait [#allocation1], 256  }
  0x93   :  { %93 = vsyncadd [#allocation1], 4294967040 }
  0x94   :  { %61 = vsyncpa [#allocation1], 1 }

// kernel: _forward_jit.1
= control target key start
LH: loop header
LB: loop body
LE: loop exit
PB: predicated region body
PF: predicated region fallthrough
CT: control target
= control target key end

     0   :  { %9 = vsyncpa [#allocation3], 0  ;;  %s2662_s0 = inlined_call_operand.vmem [shape: f32[8,256], index: 0, kind: input, shape index: {}]   ;;  %s2663_s1 = inlined_call_operand.hbm [shape: f32[288,256], index: 1, kind: input, shape index: {}]   ;;  %s2664_s2 = inlined_call_operand.vmem [shape: f32[32,72], index: 2, kind: input, shape index: {}]   ;;  %s2665_s3 = inlined_call_operand.hbm [shape: f32[40,288], index: 3, kind: input, shape index: {}]   ;;  %s2666_s4 = inlined_call_operand.vmem [shape: f32[8,256], index: 4, kind: output, shape index: {}]  }
   0x1   :  { %10 = vsyncpa [#allocation5], 0  ;;  %s1459_s15 = smov [#allocation2]   ;;  %s1411_s19 = scalar_lea.hbm %s2663_s1, 9216 }
   0x2   :  { %s18_s16 = sshll.u32 %s1459_s15, 4  ;;  %p1412_p0 = scmp.ne.s32.totalorder %s2663_s1, %s1411_s19  ;;  %s19_s16 = int_to_ptr.vmem [resolvable:$true] %s18_s16 }
   0x3   :  { %p1415_p1 = scmp.lt.u32.totalorder %s1411_s19, %s2663_s1 }
   0x5   :  { %p1417_p2 = pnand %p1415_p1, %p1412_p0 }
   0x7   :  { %1420 = shalt.err (!%p1417_p2)
}
   0x8   :  { %s1421_s24 = scalar_lea.vmem %s19_s16, 9216  ;;  %p1426_p4 = scmp.lt.s32.totalorder %s19_s16, %s19_s16 }
   0x9   :  { %p1422_p3 = scmp.ne.s32.totalorder %s19_s16, %s1421_s24  ;;  %p1427_p5 = scmp.lt.s32.totalorder %s1421_s24, %s1421_s24 }
   0xb   :  { %p1428_p6 = por %p1427_p5, %p1426_p4 }
   0xd   :  { %p1429_p7 = pnand %p1428_p6, %p1422_p3 }
   0xf   :  { %1432 = shalt.err (!%p1429_p7)
}
  0x10   :  { %s1460_s25 = smov 256   ;;  %s1461_s26 = smov 16  }
  0x11   :  { %24 = dma.hbm_to_vmem [thread:$0]  %s2663_s1, 9216, %s19_s16, [#allocation3], %s1460_s25, %s1460_s25, %s1461_s26  }
  0x12   :  { %s1462_s29 = smov [#allocation4]   ;;  %s1433_s7 = scalar_lea.hbm %s2665_s3, 1920 }
  0x13   :  { %s32_s30 = sshll.u32 %s1462_s29, 4  ;;  %p1434_p8 = scmp.ne.s32.totalorder %s2665_s3, %s1433_s7  ;;  %s33_s30 = int_to_ptr.vmem [resolvable:$true] %s32_s30 }
  0x14   :  { %p1437_p9 = scmp.lt.u32.totalorder %s1433_s7, %s2665_s3 }
  0x16   :  { %p1439_p10 = pnand %p1437_p9, %p1434_p8 }
  0x18   :  { %1442 = shalt.err (!%p1439_p10)
}
  0x19   :  { %s1443_s12 = scalar_lea.vmem %s33_s30, 1920  ;;  %p1448_p12 = scmp.lt.s32.totalorder %s33_s30, %s33_s30 }
  0x1a   :  { %p1444_p11 = scmp.ne.s32.totalorder %s33_s30, %s1443_s12  ;;  %p1449_p13 = scmp.lt.s32.totalorder %s1443_s12, %s1443_s12 }
  0x1c   :  { %p1450_p0 = por %p1449_p13, %p1448_p12 }
  0x1e   :  { %p1451_p1 = pnand %p1450_p0, %p1444_p11 }
  0x20   :  { %1454 = shalt.err (!%p1451_p1)
}
  0x21   :  { %s1463_s1 = smov 384   ;;  %s1464_s13 = smov 24  }
  0x22   :  { %38 = dma.hbm_to_vmem [thread:$0]  %s2665_s3, 1920, %s33_s30, [#allocation5], %s1463_s1, %s1463_s1, %s1464_s13  }
  0x23   :  { %1455 = dma.done.wait [#allocation3], 9216  }
  0x24   :  { %1456 = vsyncadd [#allocation3], 4294958080 }
  0x25   :  { %1457 = dma.done.wait [#allocation5], 1920  }
  0x26   :  { %1458 = vsyncadd [#allocation5], 4294965376  ;;  %v1526_v0 = vld [vmem:[%s2662_s0] sm:$0xff]  ;;  %s1465_s18 = smov 17   ;;  %v1535_v1 = vld [vmem:[%s2662_s0 + $0x8] sm:$0xff]  ;;  %s1466_s3 = smov 15   ;;  %v51_v3 = vlaneseq }
  0x27   :  { %60 = vrot.lane.b32.xlu1 %v1526_v0, %s1461_s26  ;;  %47 = vrot.lane.b32.xlu0 %v1526_v0, %s1465_s18  ;;  %s1467_s21 = smov 1   ;;  %s1468_s0 = smov 127   ;;  %v2667_v2 = vmov 0.0   ;;  %v1570_v7 = vld [vmem:[#allocation2 + $0x8] sm:$0xff]  ;;  %v1574_v9 = vld [vmem:[#allocation2] sm:$0xff]  ;;  %vm141_vm8 = vcmask 588800  }
  0x28   :  { %s1469_s22 = smov 113   ;;  %218 = vmatprep.mubr.f32.mxu0 %v2667_v2  ;;  %s1471_s23 = smov 112   ;;  %v1566_v4 = vand.u32 127, %v51_v3  ;;  %v1572_v8 = vld [vmem:[#allocation2 + $0x48] sm:$0xff]  ;;  %v1576_v10 = vld [vmem:[#allocation2 + $0x40] sm:$0xff]  ;;  %vm583_vm9 = vcmask 261120  }
  0x29   :  { %s1472_s24 = smov 111   ;;  %v1591_v25 = vld [vmem:[#allocation2 + $0x80] sm:$0xff]  ;;  %v1594_v26 = vld [vmem:[#allocation2 + $0x88] sm:$0xff] }
  0x2a   :  { %vm64_vm0 = vcmp.lt.s32.totalorder %v1566_v4, 16  ;;  %vm53_vm1 = vcmp.lt.s32.totalorder %v1566_v4, 17  ;;  %vm75_vm2 = vcmp.lt.s32.totalorder %v1566_v4, 15  ;;  %vm86_vm3 = vcmp.lt.s32.totalorder %v1566_v4, 1  ;;  %v1600_v29 = vld [vmem:[#allocation2 + $0xc0] sm:$0xff]  ;;  %v1602_v30 = vld [vmem:[#allocation2 + $0xc8] sm:$0xff] }
  0x2b   :  { %62 = vrot.lane.b32.xlu1 %v1535_v1, %s1461_s26  ;;  %49 = vrot.lane.b32.xlu0 %v1535_v1, %s1465_s18  ;;  %vm97_vm4 = vcmp.lt.s32.totalorder %v1566_v4, 127  ;;  %v1613_v39 = vld [vmem:[#allocation2 + $0x140] sm:$0xff]  ;;  %v1615_v40 = vld [vmem:[#allocation2 + $0x148] sm:$0xff]  ;;  %vm108_vm5 = vcmp.lt.s32.totalorder %v1566_v4, 113  ;;  %vm119_vm6 = vcmp.lt.s32.totalorder %v1566_v4, 112  ;;  %vm130_vm7 = vcmp.lt.s32.totalorder %v1566_v4, 111 }
  0x2c   :  { %v1626_v53 = vld [vmem:[#allocation2 + $0x180] sm:$0xff]  ;;  %v1629_v54 = vld [vmem:[#allocation2 + $0x188] sm:$0xff] }
  0x2d   :  { %v1635_v57 = vld [vmem:[#allocation2 + $0x1c0] sm:$0xff]  ;;  %v1637_v58 = vld [vmem:[#allocation2 + $0x1c8] sm:$0xff] }
  0x2f   :  { %73 = vrot.lane.b32.xlu1 %v1535_v1, %s1466_s3  ;;  %71 = vrot.lane.b32.xlu0 %v1526_v0, %s1466_s3 }
  0x33   :  { %84 = vrot.lane.b32.xlu1 %v1535_v1, %s1467_s21  ;;  %82 = vrot.lane.b32.xlu0 %v1526_v0, %s1467_s21 }
  0x37   :  { %95 = vrot.lane.b32.xlu1 %v1535_v1, %s1468_s0  ;;  %93 = vrot.lane.b32.xlu0 %v1526_v0, %s1468_s0 }
  0x3b   :  { %106 = vrot.lane.b32.xlu1 %v1535_v1, %s1469_s22  ;;  %104 = vrot.lane.b32.xlu0 %v1526_v0, %s1469_s22 }
  0x3f   :  { %117 = vrot.lane.b32.xlu1 %v1535_v1, %s1471_s23  ;;  %115 = vrot.lane.b32.xlu0 %v1526_v0, %s1471_s23 }
  0x43   :  { %128 = vrot.lane.b32.xlu1 %v1535_v1, %s1472_s24  ;;  %126 = vrot.lane.b32.xlu0 %v1526_v0, %s1472_s24 }
  0x99   :  { %v61_v5 = vpop.permute.xlu1 %60  ;;  %v48_v6 = vpop.permute.xlu0 %47 }
  0x9d   :  { %v63_v11 = vpop.permute.xlu1 %62  ;;  %v50_v12 = vpop.permute.xlu0 %49 }
  0x9e   :  { %v66_v13 = vsel %vm64_vm0, %v63_v11, %v61_v5  ;;  %v55_v14 = vsel %vm53_vm1, %v50_v12, %v48_v6  ;;  %v54_v15 = vsel %vm53_vm1, %v48_v6, %v50_v12  ;;  %v65_v16 = vsel %vm64_vm0, %v61_v5, %v63_v11  ;;  %v1648_v5 = vld [vmem:[#allocation2 + $0x208] sm:$0xff] }
  0x9f   :  { %v59_v17 = vmul.f32 %v1570_v7, %v54_v15  ;;  %v70_v18 = vmul.f32 %v1572_v8, %v65_v16  ;;  %v58_v19 = vmul.f32 %v1574_v9, %v55_v14  ;;  %v69_v20 = vmul.f32 %v1576_v10, %v66_v13  ;;  %2703 = vst [vmem:[#allocation8_spill] sm:$0xff] %v1648_v5  ;;  %v1650_v14 = vld [vmem:[#allocation2 + $0x200] sm:$0xff] }
  0xa1   :  { %v74_v21 = vpop.permute.xlu1 %73  ;;  %v72_v22 = vpop.permute.xlu0 %71  ;;  %v1211_v23 = vpack.c.bf16 %v70_v18, %v59_v17  ;;  %v1213_v24 = vpack.c.bf16 %v69_v20, %v58_v19  ;;  %v137_v19 = vld [vmem:[%s2664_s2] sm:$0xff]  ;;  %v138_v20 = vld [vmem:[%s2664_s2 + $0x8] sm:$0xff] }
  0xa2   :  { %v76_v27 = vsel %vm75_vm2, %v72_v22, %v74_v21  ;;  %v77_v28 = vsel %vm75_vm2, %v74_v21, %v72_v22  ;;  %v139_v21 = vld [vmem:[%s2664_s2 + $0x10] sm:$0xff]  ;;  %v140_v22 = vld [vmem:[%s2664_s2 + $0x18] sm:$0xff] }
  0xa3   :  { %1212 = vmatprep.subr.bf16.mxu0 %v1211_v23  ;;  %v80_v35 = vmul.f32 %v1591_v25, %v77_v28  ;;  %v81_v36 = vmul.f32 %v1594_v26, %v76_v27 }
  0xa4   :  { %1214 = vmatpush1.bf16.msra.mxu0 %v1213_v24 }
  0xa5   :  { %v85_v31 = vpop.permute.xlu1 %84  ;;  %v83_v32 = vpop.permute.xlu0 %82 }
  0xa6   :  { %v87_v33 = vsel %vm86_vm3, %v83_v32, %v85_v31  ;;  %v88_v34 = vsel %vm86_vm3, %v85_v31, %v83_v32 }
  0xa7   :  { %v91_v37 = vmul.f32 %v1600_v29, %v88_v34  ;;  %v92_v38 = vmul.f32 %v1602_v30, %v87_v33 }
  0xa9   :  { %v96_v41 = vpop.permute.xlu1 %95  ;;  %v94_v42 = vpop.permute.xlu0 %93  ;;  %v1215_v43 = vpack.c.bf16 %v92_v38, %v81_v36  ;;  %v1217_v44 = vpack.c.bf16 %v91_v37, %v80_v35 }
  0xaa   :  { %v98_v45 = vsel %vm97_vm4, %v94_v42, %v96_v41  ;;  %v99_v46 = vsel %vm97_vm4, %v96_v41, %v94_v42 }
  0xab   :  { %v102_v47 = vmul.f32 %v1613_v39, %v98_v45  ;;  %v103_v48 = vmul.f32 %v1615_v40, %v99_v46  ;;  %1216 = vmatprep.subr.bf16.mxu0 %v1215_v43  ;;  %v572_v45 = vld [vmem:[#allocation4 + $0x8] sm:$0xff] }
  0xac   :  { %1218 = vmatpush1.bf16.msra.mxu0 %v1217_v44  ;;  %660 = vmatprep.mubr.f32.mxu1 %v572_v45  ;;  %v1861_v45 = vld [vmem:[#allocation2 + $0x58] sm:$0xff] }
  0xad   :  { %v107_v49 = vpop.permute.xlu1 %106  ;;  %v105_v50 = vpop.permute.xlu0 %104  ;;  %v1219_v51 = vpack.c.bf16 %v103_v48, %v1535_v1  ;;  %v1221_v52 = vpack.c.bf16 %v102_v47, %v1526_v0  ;;  %2706 = vst [vmem:[#allocation11_spill] sm:$0xff] %v1861_v45 }
  0xae   :  { %v109_v55 = vsel %vm108_vm5, %v105_v50, %v107_v49  ;;  %v110_v56 = vsel %vm108_vm5, %v107_v49, %v105_v50 }
  0xaf   :  { %1220 = vmatprep.subr.bf16.mxu0 %v1219_v51  ;;  %v113_v63 = vmul.f32 %v1626_v53, %v109_v55  ;;  %v114_v0 = vmul.f32 %v1629_v54, %v110_v56 }
  0xb0   :  { %1222 = vmatpush1.bf16.msra.mxu0 %v1221_v52 }
  0xb1   :  { %v118_v59 = vpop.permute.xlu1 %117  ;;  %v116_v60 = vpop.permute.xlu0 %115 }
  0xb2   :  { %v120_v61 = vsel %vm119_vm6, %v116_v60, %v118_v59  ;;  %v121_v62 = vsel %vm119_vm6, %v118_v59, %v116_v60 }
  0xb3   :  { %v124_v1 = vmul.f32 %v1635_v57, %v120_v61  ;;  %v125_v3 = vmul.f32 %v1637_v58, %v121_v62 }
  0xb5   :  { %v129_v6 = vpop.permute.xlu1 %128  ;;  %v1223_v11 = vpack.c.bf16 %v125_v3, %v114_v0  ;;  %v127_v12 = vpop.permute.xlu0 %126  ;;  %v1225_v13 = vpack.c.bf16 %v124_v1, %v113_v63  ;;  %v1835_v63 = vld [vmem:[#allocation2 + $0x18] sm:$0xff]  ;;  %v1837_v0 = vld [vmem:[#allocation2 + $0x10] sm:$0xff] }
  0xb6   :  { %v131_v15 = vsel %vm130_vm7, %v127_v12, %v129_v6  ;;  %v132_v16 = vsel %vm130_vm7, %v129_v6, %v127_v12  ;;  %2704 = vst [vmem:[#allocation9_spill] sm:$0xff] %v1835_v63  ;;  %2705 = vst [vmem:[#allocation10_spill] sm:$0xff] %v1837_v0 }
  0xb7   :  { %1224 = vmatprep.subr.bf16.mxu0 %v1223_v11  ;;  %v136_v17 = vmul.f32 %v1648_v5, %v132_v16  ;;  %v135_v18 = vmul.f32 %v1650_v14, %v131_v15 }
  0xb8   :  { %1226 = vmatpush1.bf16.msra.mxu0 %v1225_v13 }
  0xb9   :  { %170 = vmatprep.subr.mxu0 %v136_v17 }
  0xbc   :  { %171 = vmatpush1.msra.mxu0 %v135_v18 }
  0xbd   :  { %1202 = vmatmul.mubr.msk.f32.vlgmr.msra.gmra.mrb[0].mxu0 %vm141_vm8, %v137_v19 }
  0xbe   :  { %224 = vmatprep.mubr.f32.mxu0 %v2667_v2 }
  0xc1   :  { %1203 = vmatmul.mubr.msk.f32.gmra.mrb[2].mxu0 %vm141_vm8, %v138_v20 }
  0xc2   :  { %230 = vmatprep.mubr.f32.mxu0 %v2667_v2 }
  0xc5   :  { %1204 = vmatmul.mubr.msk.f32.gmra.mrb[4].mxu0 %vm141_vm8, %v139_v21 }
  0xc6   :  { %236 = vmatprep.mubr.f32.mxu0 %v2667_v2 }
  0xc9   :  { %1205 = vmatmul.mubr.msk.f32.gmra.mrb[6].mxu0 %vm141_vm8, %v140_v22 }
 0x190   :  { %v220_v23 = vpop.f32.mrb[0].mxu0 }
 0x191   :  { %v1673_v24 = vmax.f32 %v220_v23, 0.0  ;;  %v222_v27 = vpop.f32.mrb[1].mxu0 }
 0x192   :  { %v1695_v37 = vmax.f32 %v222_v27, 0.0 }
 0x193   :  { %251 = vrot.lane.b32.xlu0 %v1673_v24, %s1465_s18 }
 0x194   :  { %v226_v28 = vpop.f32.mrb[2].mxu0 }
 0x195   :  { %v1677_v31 = vmax.f32 %v226_v28, 0.0  ;;  %v228_v32 = vpop.f32.mrb[3].mxu0 }
 0x196   :  { %v1701_v38 = vmax.f32 %v228_v32, 0.0 }
 0x197   :  { %291 = vrot.lane.b32.xlu0 %v1673_v24, %s1461_s26  ;;  %253 = vrot.lane.b32.xlu1 %v1677_v31, %s1465_s18 }
 0x198   :  { %v232_v33 = vpop.f32.mrb[4].mxu0 }
 0x199   :  { %v234_v34 = vpop.f32.mrb[5].mxu0  ;;  %v1711_v41 = vmax.f32 %v232_v33, 0.0 }
 0x19a   :  { %v1735_v43 = vmax.f32 %v234_v34, 0.0 }
 0x19b   :  { %331 = vrot.lane.b32.xlu0 %v1673_v24, %s1466_s3  ;;  %293 = vrot.lane.b32.xlu1 %v1677_v31, %s1461_s26 }
 0x19c   :  { %v238_v35 = vpop.f32.mrb[6].mxu0 }
 0x19d   :  { %v240_v36 = vpop.f32.mrb[7].mxu0  ;;  %v1721_v42 = vmax.f32 %v238_v35, 0.0 }
 0x19e   :  { %v1741_v44 = vmax.f32 %v240_v36, 0.0 }
 0x19f   :  { %371 = vrot.lane.b32.xlu0 %v1673_v24, %s1467_s21  ;;  %333 = vrot.lane.b32.xlu1 %v1677_v31, %s1466_s3 }
 0x1a3   :  { %411 = vrot.lane.b32.xlu0 %v1673_v24, %s1468_s0  ;;  %373 = vrot.lane.b32.xlu1 %v1677_v31, %s1467_s21 }
 0x1a7   :  { %259 = vrot.lane.b32.xlu0 %v1695_v37, %s1465_s18  ;;  %413 = vrot.lane.b32.xlu1 %v1677_v31, %s1468_s0 }
 0x1ab   :  { %299 = vrot.lane.b32.xlu0 %v1695_v37, %s1461_s26  ;;  %261 = vrot.lane.b32.xlu1 %v1701_v38, %s1465_s18 }
 0x1af   :  { %339 = vrot.lane.b32.xlu0 %v1695_v37, %s1466_s3  ;;  %301 = vrot.lane.b32.xlu1 %v1701_v38, %s1461_s26 }
 0x1b3   :  { %379 = vrot.lane.b32.xlu0 %v1695_v37, %s1467_s21  ;;  %341 = vrot.lane.b32.xlu1 %v1701_v38, %s1466_s3 }
 0x1b7   :  { %381 = vrot.lane.b32.xlu1 %v1701_v38, %s1467_s21  ;;  %255 = vrot.lane.b32.xlu0 %v1711_v41, %s1465_s18 }
 0x1bb   :  { %295 = vrot.lane.b32.xlu0 %v1711_v41, %s1461_s26  ;;  %257 = vrot.lane.b32.xlu1 %v1721_v42, %s1465_s18 }
 0x1bf   :  { %335 = vrot.lane.b32.xlu0 %v1711_v41, %s1466_s3  ;;  %297 = vrot.lane.b32.xlu1 %v1721_v42, %s1461_s26 }
 0x1c3   :  { %375 = vrot.lane.b32.xlu0 %v1711_v41, %s1467_s21  ;;  %337 = vrot.lane.b32.xlu1 %v1721_v42, %s1466_s3 }
 0x1c7   :  { %263 = vrot.lane.b32.xlu0 %v1735_v43, %s1465_s18  ;;  %377 = vrot.lane.b32.xlu1 %v1721_v42, %s1467_s21 }
 0x1cb   :  { %419 = vrot.lane.b32.xlu0 %v1695_v37, %s1468_s0  ;;  %265 = vrot.lane.b32.xlu1 %v1741_v44, %s1465_s18 }
 0x1cf   :  { %303 = vrot.lane.b32.xlu0 %v1735_v43, %s1461_s26  ;;  %421 = vrot.lane.b32.xlu1 %v1701_v38, %s1468_s0 }
 0x1d3   :  { %343 = vrot.lane.b32.xlu0 %v1735_v43, %s1466_s3  ;;  %305 = vrot.lane.b32.xlu1 %v1741_v44, %s1461_s26 }
 0x1d7   :  { %383 = vrot.lane.b32.xlu0 %v1735_v43, %s1467_s21  ;;  %417 = vrot.lane.b32.xlu1 %v1721_v42, %s1468_s0 }
 0x1db   :  { %415 = vrot.lane.b32.xlu0 %v1711_v41, %s1468_s0  ;;  %345 = vrot.lane.b32.xlu1 %v1741_v44, %s1466_s3 }
 0x1df   :  { %423 = vrot.lane.b32.xlu0 %v1735_v43, %s1468_s0  ;;  %453 = vrot.lane.b32.xlu1 %v1677_v31, %s1469_s22 }
 0x1e3   :  { %451 = vrot.lane.b32.xlu0 %v1673_v24, %s1469_s22  ;;  %385 = vrot.lane.b32.xlu1 %v1741_v44, %s1467_s21 }
 0x1e7   :  { %459 = vrot.lane.b32.xlu0 %v1695_v37, %s1469_s22  ;;  %461 = vrot.lane.b32.xlu1 %v1701_v38, %s1469_s22 }
 0x1eb   :  { %455 = vrot.lane.b32.xlu0 %v1711_v41, %s1469_s22  ;;  %457 = vrot.lane.b32.xlu1 %v1721_v42, %s1469_s22 }
 0x1ef   :  { %463 = vrot.lane.b32.xlu0 %v1735_v43, %s1469_s22  ;;  %493 = vrot.lane.b32.xlu1 %v1677_v31, %s1471_s23 }
 0x1f3   :  { %491 = vrot.lane.b32.xlu0 %v1673_v24, %s1471_s23  ;;  %425 = vrot.lane.b32.xlu1 %v1741_v44, %s1468_s0 }
 0x1f7   :  { %499 = vrot.lane.b32.xlu0 %v1695_v37, %s1471_s23  ;;  %501 = vrot.lane.b32.xlu1 %v1701_v38, %s1471_s23 }
 0x1fb   :  { %495 = vrot.lane.b32.xlu0 %v1711_v41, %s1471_s23  ;;  %465 = vrot.lane.b32.xlu1 %v1741_v44, %s1469_s22 }
 0x1ff   :  { %503 = vrot.lane.b32.xlu0 %v1735_v43, %s1471_s23  ;;  %497 = vrot.lane.b32.xlu1 %v1721_v42, %s1471_s23 }
 0x203   :  { %531 = vrot.lane.b32.xlu0 %v1673_v24, %s1472_s24  ;;  %505 = vrot.lane.b32.xlu1 %v1741_v44, %s1471_s23 }
 0x205   :  { %v252_v46 = vpop.permute.xlu0 %251 }
 0x207   :  { %539 = vrot.lane.b32.xlu0 %v1695_v37, %s1472_s24  ;;  %533 = vrot.lane.b32.xlu1 %v1677_v31, %s1472_s24 }
 0x209   :  { %v1807_v47 = vpop.permute.xlu0 %291  ;;  %v254_v48 = vpop.permute.xlu1 %253 }
 0x20b   :  { %535 = vrot.lane.b32.xlu0 %v1711_v41, %s1472_s24  ;;  %541 = vrot.lane.b32.xlu1 %v1701_v38, %s1472_s24 }
 0x20d   :  { %v1813_v49 = vpop.permute.xlu0 %331  ;;  %v294_v50 = vpop.permute.xlu1 %293 }
 0x20f   :  { %543 = vrot.lane.b32.xlu0 %v1735_v43, %s1472_s24  ;;  %537 = vrot.lane.b32.xlu1 %v1721_v42, %s1472_s24 }
 0x211   :  { %v1819_v51 = vpop.permute.xlu0 %371  ;;  %v1821_v52 = vpop.permute.xlu1 %333 }
 0x213   :  { %545 = vrot.lane.b32.xlu1 %v1741_v44, %s1472_s24 }
 0x215   :  { %v1825_v55 = vpop.permute.xlu0 %411  ;;  %v1827_v56 = vpop.permute.xlu1 %373 }
 0x219   :  { %v260_v59 = vpop.permute.xlu0 %259  ;;  %v1829_v60 = vpop.permute.xlu1 %413 }
 0x21a   :  { %v271_v61 = vsel %vm53_vm1, %v260_v59, %v252_v46  ;;  %v267_v62 = vsel %vm53_vm1, %v252_v46, %v260_v59  ;;  %v1867_v59 = vld [vmem:[#allocation2 + $0x28] sm:$0xff] }
 0x21b   :  { %v284_v12 = vmul.f32 %v267_v62, %v1570_v7  ;;  %v283_v15 = vmul.f32 %v271_v61, %v1574_v9 }
 0x21d   :  { %v300_v1 = vpop.permute.xlu0 %299  ;;  %v262_v3 = vpop.permute.xlu1 %261 }
 0x21e   :  { %v272_v6 = vsel %vm53_vm1, %v262_v3, %v254_v48  ;;  %v268_v11 = vsel %vm53_vm1, %v254_v48, %v262_v3  ;;  %v1865_v48 = vld [vmem:[#allocation2 + $0x20] sm:$0xff]  ;;  %v1873_v3 = vld [vmem:[#allocation2 + $0x30] sm:$0xff] }
 0x21f   :  { %v286_v13 = vmul.f32 %v1835_v63, %v268_v11  ;;  %v285_v16 = vmul.f32 %v1837_v0, %v272_v6  ;;  %v1875_v6 = vld [vmem:[#allocation2 + $0x38] sm:$0xff]  ;;  %v307_v11 = vsel %vm64_vm0, %v1807_v47, %v300_v1 }
 0x221   :  { %v1847_v17 = vpop.permute.xlu0 %339  ;;  %v302_v18 = vpop.permute.xlu1 %301  ;;  %v1227_v19 = vpack.c.bf16 %v286_v13, %v284_v12  ;;  %v1229_v20 = vpack.c.bf16 %v285_v16, %v283_v15  ;;  %v1882_v15 = vld [vmem:[#allocation2 + $0x50] sm:$0xff] }
 0x222   :  { %v308_v46 = vsel %vm64_vm0, %v294_v50, %v302_v18  ;;  %v312_v16 = vsel %vm64_vm0, %v302_v18, %v294_v50  ;;  %v311_v50 = vsel %vm64_vm0, %v300_v1, %v1807_v47  ;;  %v324_v18 = vmul.f32 %v307_v11, %v1572_v8  ;;  %v1910_v8 = vld [vmem:[#allocation2 + $0x68] sm:$0xff] }
 0x223   :  { %1228 = vmatprep.subr.bf16.mxu1 %v1227_v19  ;;  %v326_v19 = vmul.f32 %v1861_v45, %v308_v46  ;;  %v325_v46 = vmul.f32 %v1882_v15, %v312_v16 }
 0x224   :  { %1230 = vmatpush1.bf16.msra.mxu1 %v1229_v20 }
 0x225   :  { %v1849_v21 = vpop.permute.xlu0 %379  ;;  %v342_v22 = vpop.permute.xlu1 %341  ;;  %v1235_v47 = vpack.c.bf16 %v326_v19, %v324_v18 }
 0x229   :  { %v1851_v23 = vpop.permute.xlu1 %381  ;;  %v256_v27 = vpop.permute.xlu0 %255 }
 0x22d   :  { %v296_v7 = vpop.permute.xlu0 %295  ;;  %v258_v28 = vpop.permute.xlu1 %257 }
 0x231   :  { %v1853_v32 = vpop.permute.xlu0 %335  ;;  %v298_v9 = vpop.permute.xlu1 %297 }
 0x235   :  { %v1855_v33 = vpop.permute.xlu0 %375  ;;  %v1857_v34 = vpop.permute.xlu1 %337 }
 0x239   :  { %v264_v35 = vpop.permute.xlu0 %263  ;;  %v1859_v36 = vpop.permute.xlu1 %377 }
 0x23a   :  { %v269_v61 = vsel %vm53_vm1, %v256_v27, %v264_v35  ;;  %v273_v62 = vsel %vm53_vm1, %v264_v35, %v256_v27 }
 0x23b   :  { %v287_v35 = vmul.f32 %v1865_v48, %v273_v62  ;;  %v288_v2 = vmul.f32 %v1867_v59, %v269_v61  ;;  %v323_v62 = vmul.f32 %v311_v50, %v1576_v10  ;;  %v1903_v61 = vld [vmem:[#allocation2 + $0x98] sm:$0xff]  ;;  %v1916_v10 = vld [vmem:[#allocation2 + $0x70] sm:$0xff] }
 0x23d   :  { %v1880_v12 = vpop.permute.xlu0 %419  ;;  %v266_v13 = vpop.permute.xlu1 %265  ;;  %v1237_v19 = vpack.c.bf16 %v325_v46, %v323_v62 }
 0x23e   :  { %v270_v20 = vsel %vm53_vm1, %v258_v28, %v266_v13  ;;  %v274_v27 = vsel %vm53_vm1, %v266_v13, %v258_v28 }
 0x23f   :  { %v289_v63 = vmul.f32 %v1873_v3, %v274_v27  ;;  %v290_v0 = vmul.f32 %v1875_v6, %v270_v20  ;;  %v348_v20 = vsel %vm75_vm2, %v1821_v52, %v342_v22  ;;  %v1908_v27 = vld [vmem:[#allocation2 + $0x60] sm:$0xff] }
 0x241   :  { %v304_v45 = vpop.permute.xlu0 %303  ;;  %v1900_v5 = vpop.permute.xlu1 %421  ;;  %v1231_v28 = vpack.c.bf16 %v290_v0, %v288_v2  ;;  %v1233_v13 = vpack.c.bf16 %v289_v63, %v287_v35  ;;  %v1918_v63 = vld [vmem:[#allocation2 + $0x78] sm:$0xff]  ;;  %v347_v0 = vsel %vm75_vm2, %v1813_v49, %v1847_v17  ;;  %v1924_v35 = vld [vmem:[#allocation2 + $0x90] sm:$0xff] }
 0x242   :  { %v309_v1 = vsel %vm64_vm0, %v296_v7, %v304_v45  ;;  %v313_v2 = vsel %vm64_vm0, %v304_v45, %v296_v7  ;;  %v352_v7 = vsel %vm75_vm2, %v342_v22, %v1821_v52  ;;  %v366_v45 = vmul.f32 %v1903_v61, %v348_v20 }
 0x243   :  { %1232 = vmatprep.subr.bf16.mxu1 %v1231_v28  ;;  %v327_v28 = vmul.f32 %v1908_v27, %v313_v2  ;;  %v351_v52 = vsel %vm75_vm2, %v1847_v17, %v1813_v49  ;;  %v364_v22 = vmul.f32 %v347_v0, %v1594_v26  ;;  %v365_v20 = vmul.f32 %v1924_v35, %v352_v7  ;;  %v1953_v49 = vld [vmem:[#allocation2 + $0xa0] sm:$0xff]  ;;  %v1955_v17 = vld [vmem:[#allocation2 + $0xa8] sm:$0xff]  ;;  %v1965_v7 = vld [vmem:[#allocation2 + $0xb8] sm:$0xff] }
 0x244   :  { %1234 = vmatpush1.bf16.msra.mxu1 %v1233_v13  ;;  %v328_v13 = vmul.f32 %v1910_v8, %v309_v1  ;;  %v363_v1 = vmul.f32 %v351_v52, %v1591_v25  ;;  %2707 = vst [vmem:[#allocation12_spill] sm:$0xff] %v1965_v7 }
 0x245   :  { %v344_v11 = vpop.permute.xlu0 %343  ;;  %1236 = vmatprep.subr.bf16.mxu1 %v1235_v47  ;;  %v306_v16 = vpop.permute.xlu1 %305  ;;  %v1243_v26 = vpack.c.bf16 %v366_v45, %v364_v22  ;;  %v387_v45 = vsel %vm86_vm3, %v1819_v51, %v1849_v21  ;;  %v1984_v22 = vld [vmem:[#allocation2 + $0xd0] sm:$0xff] }
 0x246   :  { %v310_v50 = vsel %vm64_vm0, %v298_v9, %v306_v16  ;;  %v314_v18 = vsel %vm64_vm0, %v306_v16, %v298_v9  ;;  %v349_v0 = vsel %vm75_vm2, %v1853_v32, %v344_v11  ;;  %v353_v25 = vsel %vm75_vm2, %v344_v11, %v1853_v32 }
 0x247   :  { %v329_v46 = vmul.f32 %v1916_v10, %v314_v18  ;;  %v330_v62 = vmul.f32 %v1918_v63, %v310_v50  ;;  %v1947_v18 = vld [vmem:[#allocation2 + $0xd8] sm:$0xff]  ;;  %v388_v50 = vsel %vm86_vm3, %v1827_v56, %v1851_v23  ;;  %v392_v32 = vsel %vm86_vm3, %v1851_v23, %v1827_v56 }
 0x248   :  { %1238 = vmatpush1.bf16.msra.mxu1 %v1237_v19  ;;  %v1963_v19 = vld [vmem:[#allocation2 + $0xb0] sm:$0xff]  ;;  %v406_v11 = vmul.f32 %v1947_v18, %v388_v50  ;;  %v391_v23 = vsel %vm86_vm3, %v1849_v21, %v1819_v51 }
 0x249   :  { %v384_v47 = vpop.permute.xlu0 %383  ;;  %v1944_v9 = vpop.permute.xlu1 %417  ;;  %v1239_v2 = vpack.c.bf16 %v330_v62, %v328_v13  ;;  %v1241_v16 = vpack.c.bf16 %v329_v46, %v327_v28  ;;  %v1245_v46 = vpack.c.bf16 %v365_v20, %v363_v1  ;;  %v368_v20 = vmul.f32 %v1955_v17, %v349_v0  ;;  %v1998_v0 = vld [vmem:[#allocation2 + $0xe0] sm:$0xff]  ;;  %v2009_v21 = vld [vmem:[#allocation2 + $0xf0] sm:$0xff] }
 0x24a   :  { %v404_v1 = vmul.f32 %v387_v45, %v1602_v30  ;;  %v389_v51 = vsel %vm86_vm3, %v1855_v33, %v384_v47  ;;  %v393_v30 = vsel %vm86_vm3, %v384_v47, %v1855_v33  ;;  %2709 = vst [vmem:[#allocation14_spill] sm:$0xff] %v2009_v21  ;;  %v2011_v45 = vld [vmem:[#allocation2 + $0xf8] sm:$0xff] }
 0x24b   :  { %1240 = vmatprep.subr.bf16.mxu1 %v1239_v2  ;;  %v367_v2 = vmul.f32 %v1953_v49, %v353_v25  ;;  %v405_v25 = vmul.f32 %v1984_v22, %v392_v32  ;;  %2710 = vst [vmem:[#allocation15_spill] sm:$0xff] %v2011_v45 }
 0x24c   :  { %1242 = vmatpush1.bf16.msra.mxu1 %v1241_v16 }
 0x24d   :  { %v1971_v28 = vpop.permute.xlu0 %415  ;;  %1244 = vmatprep.subr.bf16.mxu1 %v1243_v26  ;;  %v346_v13 = vpop.permute.xlu1 %345 }
 0x24e   :  { %v350_v62 = vsel %vm75_vm2, %v1857_v34, %v346_v13  ;;  %v354_v52 = vsel %vm75_vm2, %v346_v13, %v1857_v34 }
 0x24f   :  { %v369_v16 = vmul.f32 %v1963_v19, %v354_v52  ;;  %v370_v56 = vmul.f32 %v1965_v7, %v350_v62  ;;  %v1251_v52 = vpack.c.bf16 %v406_v11, %v404_v1  ;;  %v2001_v62 = vld [vmem:[#allocation2 + $0xe8] sm:$0xff]  ;;  %v2025_v7 = vld [vmem:[#allocation2 + $0x158] sm:$0xff] }
 0x250   :  { %1246 = vmatpush1.bf16.msra.mxu1 %v1245_v46  ;;  %v403_v46 = vmul.f32 %v391_v23, %v1600_v29  ;;  %2708 = vst [vmem:[#allocation13_spill] sm:$0xff] %v2001_v62  ;;  %v408_v33 = vmul.f32 %v2001_v62, %v389_v51  ;;  %v431_v51 = vsel %vm97_vm4, %v1880_v12, %v1825_v55  ;;  %v2099_v62 = vld [vmem:[#allocation2 + $0x1a0] sm:$0xff] }
 0x251   :  { %v424_v50 = vpop.permute.xlu0 %423  ;;  %v1995_v34 = vpop.permute.xlu1 %453  ;;  %v1247_v26 = vpack.c.bf16 %v370_v56, %v368_v20  ;;  %v1249_v13 = vpack.c.bf16 %v369_v16, %v367_v2  ;;  %v407_v16 = vmul.f32 %v1998_v0, %v393_v30  ;;  %v2037_v30 = vld [vmem:[#allocation2 + $0x150] sm:$0xff]  ;;  %2717 = vst [vmem:[#allocation22_spill] sm:$0xff] %v2099_v62 }
 0x252   :  { %v1253_v20 = vpack.c.bf16 %v405_v25, %v403_v46 }
 0x253   :  { %1248 = vmatprep.subr.bf16.mxu1 %v1247_v26 }
 0x254   :  { %1250 = vmatpush1.bf16.msra.mxu1 %v1249_v13 }
 0x255   :  { %v452_v32 = vpop.permute.xlu0 %451  ;;  %1252 = vmatprep.subr.bf16.mxu1 %v1251_v52  ;;  %v386_v11 = vpop.permute.xlu1 %385  ;;  %v1259_v52 = vpack.c.bf16 %v1701_v38, %v1695_v37 }
 0x256   :  { %v390_v29 = vsel %vm86_vm3, %v1859_v36, %v386_v11  ;;  %v394_v2 = vsel %vm86_vm3, %v386_v11, %v1859_v36  ;;  %v432_v36 = vsel %vm97_vm4, %v1900_v5, %v1829_v60  ;;  %v428_v11 = vsel %vm97_vm4, %v1829_v60, %v1900_v5  ;;  %v2054_v60 = vld [vmem:[#allocation2 + $0x160] sm:$0xff] }
 0x257   :  { %v409_v47 = vmul.f32 %v2009_v21, %v394_v2  ;;  %v410_v56 = vmul.f32 %v2011_v45, %v390_v29  ;;  %v1261_v29 = vpack.c.bf16 %v1677_v31, %v1673_v24  ;;  %v446_v2 = vmul.f32 %v2025_v7, %v432_v36  ;;  %2711 = vst [vmem:[#allocation16_spill] sm:$0xff] %v2054_v60  ;;  %v2082_v45 = vld [vmem:[#allocation2 + $0x190] sm:$0xff] }
 0x258   :  { %1254 = vmatpush1.bf16.msra.mxu1 %v1253_v20  ;;  %v1263_v20 = vpack.c.bf16 %v1741_v44, %v1735_v43  ;;  %2716 = vst [vmem:[#allocation21_spill] sm:$0xff] %v2082_v45 }
 0x259   :  { %v460_v23 = vpop.permute.xlu0 %459  ;;  %v462_v1 = vpop.permute.xlu1 %461  ;;  %v1255_v26 = vpack.c.bf16 %v410_v56, %v408_v33  ;;  %v1257_v13 = vpack.c.bf16 %v409_v47, %v407_v16  ;;  %v427_v16 = vsel %vm97_vm4, %v1825_v55, %v1880_v12  ;;  %v444_v33 = vmul.f32 %v431_v51, %v1615_v40  ;;  %v2069_v51 = vld [vmem:[#allocation2 + $0x198] sm:$0xff] }
 0x25a   :  { %v445_v47 = vmul.f32 %v2037_v30, %v428_v11  ;;  %v433_v55 = vsel %vm97_vm4, %v424_v50, %v1971_v28  ;;  %v1265_v40 = vpack.c.bf16 %v1721_v42, %v1711_v41  ;;  %v443_v12 = vmul.f32 %v427_v16, %v1613_v39  ;;  %2713 = vst [vmem:[#allocation18_spill] sm:$0xff] %v2069_v51 }
 0x25b   :  { %1256 = vmatprep.subr.bf16.mxu1 %v1255_v26  ;;  %v2056_v26 = vld [vmem:[#allocation2 + $0x168] sm:$0xff]  ;;  %v471_v36 = vsel %vm108_vm5, %v460_v23, %v452_v32  ;;  %v472_v11 = vsel %vm108_vm5, %v462_v1, %v1995_v34 }
 0x25c   :  { %1258 = vmatpush1.bf16.msra.mxu1 %v1257_v13  ;;  %2712 = vst [vmem:[#allocation17_spill] sm:$0xff] %v2056_v26  ;;  %v429_v13 = vsel %vm97_vm4, %v1971_v28, %v424_v50  ;;  %v448_v50 = vmul.f32 %v2056_v26, %v433_v55  ;;  %v1269_v16 = vpack.c.bf16 %v445_v47, %v443_v12 }
 0x25d   :  { %v456_v25 = vpop.permute.xlu0 %455  ;;  %1260 = vmatprep.subr.bf16.mxu1 %v1259_v52  ;;  %v2031_v46 = vpop.permute.xlu1 %457  ;;  %v1267_v52 = vpack.c.bf16 %v446_v2, %v444_v33  ;;  %v447_v28 = vmul.f32 %v2054_v60, %v429_v13  ;;  %v467_v33 = vsel %vm108_vm5, %v452_v32, %v460_v23  ;;  %v484_v55 = vmul.f32 %v471_v36, %v1629_v54 }
 0x25e   :  { %v486_v47 = vmul.f32 %v2069_v51, %v472_v11  ;;  %v483_v12 = vmul.f32 %v467_v33, %v1626_v53  ;;  %v2109_v11 = vld [vmem:[#allocation2 + $0x1d8] sm:$0xff] }
 0x25f   :  { %2719 = vst [vmem:[#allocation24_spill] sm:$0xff] %v2109_v11 }
 0x260   :  { %1262 = vmatpush1.bf16.msra.mxu1 %v1261_v29  ;;  %v2074_v29 = vld [vmem:[#allocation2 + $0x170] sm:$0xff]  ;;  %v1275_v36 = vpack.c.bf16 %v486_v47, %v484_v55 }
 0x261   :  { %v464_v56 = vpop.permute.xlu0 %463  ;;  %v494_v5 = vpop.permute.xlu1 %493  ;;  %1264 = vmatprep.subr.bf16.mxu1 %v1263_v20  ;;  %2714 = vst [vmem:[#allocation19_spill] sm:$0xff] %v2074_v29  ;;  %v2076_v20 = vld [vmem:[#allocation2 + $0x178] sm:$0xff] }
 0x262   :  { %2715 = vst [vmem:[#allocation20_spill] sm:$0xff] %v2076_v20  ;;  %v469_v54 = vsel %vm108_vm5, %v456_v25, %v464_v56 }
 0x264   :  { %1266 = vmatpush1.bf16.msra.mxu1 %v1265_v40  ;;  %v468_v40 = vsel %vm108_vm5, %v1995_v34, %v462_v1 }
 0x265   :  { %v492_v39 = vpop.permute.xlu0 %491  ;;  %v426_v2 = vpop.permute.xlu1 %425  ;;  %1268 = vmatprep.subr.bf16.mxu1 %v1267_v52  ;;  %v485_v34 = vmul.f32 %v2082_v45, %v468_v40 }
 0x266   :  { %v430_v21 = vsel %vm97_vm4, %v1944_v9, %v426_v2  ;;  %v434_v13 = vsel %vm97_vm4, %v426_v2, %v1944_v9  ;;  %v2101_v9 = vld [vmem:[#allocation2 + $0x1a8] sm:$0xff]  ;;  %v2115_v2 = vld [vmem:[#allocation2 + $0x1b8] sm:$0xff] }
 0x267   :  { %v449_v32 = vmul.f32 %v2074_v29, %v430_v21  ;;  %v450_v23 = vmul.f32 %v2076_v20, %v434_v13  ;;  %2718 = vst [vmem:[#allocation23_spill] sm:$0xff] %v2101_v9  ;;  %v473_v21 = vsel %vm108_vm5, %v464_v56, %v456_v25  ;;  %2721 = vst [vmem:[#allocation26_spill] sm:$0xff] %v2115_v2 }
 0x268   :  { %1270 = vmatpush1.bf16.msra.mxu1 %v1269_v16  ;;  %v487_v16 = vmul.f32 %v2099_v62, %v469_v54  ;;  %v488_v33 = vmul.f32 %v2101_v9, %v473_v21  ;;  %v2740_v62 = vld [vmem:[#allocation11_spill] sm:$0xff] }
 0x269   :  { %v500_v1 = vpop.permute.xlu0 %499  ;;  %v502_v52 = vpop.permute.xlu1 %501  ;;  %v1271_v26 = vpack.c.bf16 %v450_v23, %v448_v50  ;;  %v1273_v60 = vpack.c.bf16 %v449_v32, %v447_v28  ;;  %v2113_v50 = vld [vmem:[#allocation2 + $0x1b0] sm:$0xff] }
 0x26a   :  { %v511_v53 = vsel %vm119_vm6, %v500_v1, %v492_v39  ;;  %v512_v28 = vsel %vm119_vm6, %v502_v52, %v494_v5  ;;  %2720 = vst [vmem:[#allocation25_spill] sm:$0xff] %v2113_v50  ;;  %v507_v40 = vsel %vm119_vm6, %v492_v39, %v500_v1  ;;  %v508_v13 = vsel %vm119_vm6, %v494_v5, %v502_v52  ;;  %v2130_v32 = vld [vmem:[#allocation2 + $0x1d0] sm:$0xff] }
 0x26b   :  { %1272 = vmatprep.subr.bf16.mxu1 %v1271_v26  ;;  %v1277_v26 = vpack.c.bf16 %v485_v34, %v483_v12  ;;  %v524_v47 = vmul.f32 %v511_v53, %v1637_v58  ;;  %2722 = vst [vmem:[#allocation27_spill] sm:$0xff] %v2130_v32  ;;  %v526_v23 = vmul.f32 %v2109_v11, %v512_v28 }
 0x26c   :  { %1274 = vmatpush1.bf16.msra.mxu1 %v1273_v60  ;;  %v523_v54 = vmul.f32 %v507_v40, %v1635_v57  ;;  %v525_v21 = vmul.f32 %v2130_v32, %v508_v13 }
 0x26d   :  { %v496_v25 = vpop.permute.xlu0 %495  ;;  %v466_v56 = vpop.permute.xlu1 %465  ;;  %1276 = vmatprep.subr.bf16.mxu1 %v1275_v36  ;;  %v1283_v58 = vpack.c.bf16 %v526_v23, %v524_v47  ;;  %v2139_v36 = vld [vmem:[#allocation2 + $0x1e8] sm:$0xff] }
 0x26e   :  { %v470_v60 = vsel %vm108_vm5, %v2031_v46, %v466_v56  ;;  %v474_v55 = vsel %vm108_vm5, %v466_v56, %v2031_v46  ;;  %v2137_v46 = vld [vmem:[#allocation2 + $0x1e0] sm:$0xff]  ;;  %2724 = vst [vmem:[#allocation29_spill] sm:$0xff] %v2139_v36  ;;  %v2145_v56 = vld [vmem:[#allocation2 + $0x1f0] sm:$0xff]  ;;  %v1285_v13 = vpack.c.bf16 %v525_v21, %v523_v54  ;;  %v2163_v54 = vld [vmem:[#allocation2 + $0x218] sm:$0xff] }
 0x26f   :  { %v489_v12 = vmul.f32 %v2113_v50, %v470_v60  ;;  %v490_v39 = vmul.f32 %v2115_v2, %v474_v55  ;;  %2723 = vst [vmem:[#allocation28_spill] sm:$0xff] %v2137_v46  ;;  %2725 = vst [vmem:[#allocation30_spill] sm:$0xff] %v2145_v56  ;;  %v571_v21 = vld [vmem:[#allocation4] sm:$0xff] }
 0x270   :  { %1278 = vmatpush1.bf16.msra.mxu1 %v1277_v26  ;;  %2728 = vst [vmem:[#allocation33_spill] sm:$0xff] %v2163_v54 }
 0x271   :  { %v504_v5 = vpop.permute.xlu0 %503  ;;  %v498_v34 = vpop.permute.xlu1 %497  ;;  %v1279_v1 = vpack.c.bf16 %v490_v39, %v488_v33  ;;  %v1281_v52 = vpack.c.bf16 %v489_v12, %v487_v16  ;;  %v2147_v16 = vld [vmem:[#allocation2 + $0x1f8] sm:$0xff] }
 0x272   :  { %v509_v53 = vsel %vm119_vm6, %v496_v25, %v504_v5  ;;  %v513_v28 = vsel %vm119_vm6, %v504_v5, %v496_v25  ;;  %2726 = vst [vmem:[#allocation31_spill] sm:$0xff] %v2147_v16 }
 0x273   :  { %1280 = vmatprep.subr.bf16.mxu1 %v1279_v1  ;;  %v527_v60 = vmul.f32 %v2137_v46, %v509_v53  ;;  %v528_v55 = vmul.f32 %v2139_v36, %v513_v28  ;;  %v575_v28 = vld [vmem:[#allocation4 + $0x20] sm:$0xff]  ;;  %v2175_v36 = vld [vmem:[#allocation2 + $0x228] sm:$0xff] }
 0x274   :  { %1282 = vmatpush1.bf16.msra.mxu1 %v1281_v52  ;;  %v2161_v52 = vld [vmem:[#allocation2 + $0x210] sm:$0xff]  ;;  %2731 = vst [vmem:[#allocation34_spill] sm:$0xff] %v2175_v36 }
 0x275   :  { %v532_v57 = vpop.permute.xlu0 %531  ;;  %v506_v33 = vpop.permute.xlu1 %505  ;;  %1284 = vmatprep.subr.bf16.mxu1 %v1283_v58  ;;  %2727 = vst [vmem:[#allocation32_spill] sm:$0xff] %v2161_v52 }
 0x276   :  { %v510_v26 = vsel %vm119_vm6, %v498_v34, %v506_v33  ;;  %v514_v40 = vsel %vm119_vm6, %v506_v33, %v498_v34 }
 0x277   :  { %v529_v25 = vmul.f32 %v2145_v56, %v510_v26  ;;  %v530_v47 = vmul.f32 %v2147_v16, %v514_v40  ;;  %v578_v16 = vld [vmem:[#allocation4 + $0x38] sm:$0xff]  ;;  %v2173_v56 = vld [vmem:[#allocation2 + $0x220] sm:$0xff] }
 0x278   :  { %1286 = vmatpush1.bf16.msra.mxu1 %v1285_v13  ;;  %v2729_v13 = vld [vmem:[#allocation8_spill] sm:$0xff] }
 0x279   :  { %v540_v23 = vpop.permute.xlu0 %539  ;;  %v534_v12 = vpop.permute.xlu1 %533  ;;  %v1287_v39 = vpack.c.bf16 %v530_v47, %v528_v55  ;;  %v1289_v5 = vpack.c.bf16 %v529_v25, %v527_v60  ;;  %v574_v25 = vld [vmem:[#allocation4 + $0x18] sm:$0xff]  ;;  %2730 = vst [vmem:[#allocation8_spill] sm:$0xff] %v2173_v56 }
 0x27a   :  { %v547_v1 = vsel %vm130_vm7, %v532_v57, %v540_v23  ;;  %v551_v34 = vsel %vm130_vm7, %v540_v23, %v532_v57 }
 0x27b   :  { %1288 = vmatprep.subr.bf16.mxu1 %v1287_v39  ;;  %v563_v40 = vmul.f32 %v547_v1, %v1650_v14  ;;  %v564_v60 = vmul.f32 %v551_v34, %v2729_v13  ;;  %v2181_v1 = vld [vmem:[#allocation2 + $0x230] sm:$0xff]  ;;  %v2183_v34 = vld [vmem:[#allocation2 + $0x238] sm:$0xff] }
 0x27c   :  { %1290 = vmatpush1.bf16.msra.mxu1 %v1289_v5  ;;  %2732 = vst [vmem:[#allocation35_spill] sm:$0xff] %v2181_v1  ;;  %2733 = vst [vmem:[#allocation36_spill] sm:$0xff] %v2183_v34 }
 0x27d   :  { %v536_v58 = vpop.permute.xlu0 %535  ;;  %v542_v53 = vpop.permute.xlu1 %541 }
 0x27e   :  { %v548_v33 = vsel %vm130_vm7, %v534_v12, %v542_v53  ;;  %v552_v26 = vsel %vm130_vm7, %v542_v53, %v534_v12 }
 0x27f   :  { %v565_v57 = vmul.f32 %v2161_v52, %v548_v33  ;;  %v566_v55 = vmul.f32 %v2163_v54, %v552_v26  ;;  %661 = vmatmul.mubr.f32.vlgmr.msra.gmra.mrb[0].mxu1 %v571_v21  ;;  %v577_v21 = vld [vmem:[#allocation4 + $0x30] sm:$0xff]  ;;  %v2736_v52 = vld [vmem:[#allocation9_spill] sm:$0xff] }
 0x280   :  { %666 = vmatprep.mubr.f32.mxu1 %v575_v28  ;;  %v581_v28 = vld [vmem:[#allocation4 + $0x50] sm:$0xff] }
 0x281   :  { %v1293_v47 = vpack.c.bf16 %v565_v57, %v563_v40  ;;  %v544_v23 = vpop.permute.xlu0 %543  ;;  %v538_v39 = vpop.permute.xlu1 %537  ;;  %v1291_v5 = vpack.c.bf16 %v566_v55, %v564_v60 }
 0x282   :  { %v549_v14 = vsel %vm130_vm7, %v536_v58, %v544_v23  ;;  %v553_v12 = vsel %vm130_vm7, %v544_v23, %v536_v58  ;;  %v576_v23 = vld [vmem:[#allocation4 + $0x28] sm:$0xff] }
 0x283   :  { %667 = vmatmul.mubr.f32.gmra.mrb[2].mxu1 %v574_v25  ;;  %1292 = vmatprep.subr.bf16.mxu1 %v1291_v5  ;;  %v567_v40 = vmul.f32 %v2173_v56, %v549_v14  ;;  %v568_v13 = vmul.f32 %v2175_v36, %v553_v12  ;;  %v2734_v25 = vmov 0.0   ;;  %v582_v5 = vld [vmem:[#allocation4 + $0x58] sm:$0xff]  ;;  %v2735_v36 = vld [vmem:[#allocation10_spill] sm:$0xff] }
 0x284   :  { %1294 = vmatpush1.bf16.msra.mxu1 %v1293_v47  ;;  %672 = vmatprep.mubr.f32.mxu1 %v578_v16  ;;  %v580_v16 = vld [vmem:[#allocation4 + $0x48] sm:$0xff]  ;;  %v573_v47 = vld [vmem:[#allocation4 + $0x10] sm:$0xff] }
 0x285   :  { %v546_v53 = vpop.permute.xlu1 %545 }
 0x286   :  { %v550_v33 = vsel %vm130_vm7, %v538_v39, %v546_v53  ;;  %v554_v26 = vsel %vm130_vm7, %v546_v53, %v538_v39  ;;  %v579_v39 = vld [vmem:[#allocation4 + $0x40] sm:$0xff] }
 0x287   :  { %v569_v58 = vmul.f32 %v2181_v1, %v550_v33  ;;  %v570_v60 = vmul.f32 %v2183_v34, %v554_v26  ;;  %673 = vmatmul.mubr.f32.gmra.mrb[4].mxu1 %v577_v21  ;;  %v1396_v34 = vld [vmem:[#allocation2 + $0x8] sm:$0xff] }
 0x288   :  { %678 = vmatprep.mubr.f32.mxu1 %v581_v28 }
 0x289   :  { %v1297_v57 = vpack.c.bf16 %v569_v58, %v567_v40  ;;  %v1295_v55 = vpack.c.bf16 %v570_v60, %v568_v13 }
 0x28b   :  { %679 = vmatmul.mubr.f32.gmra.mrb[6].mxu1 %v580_v16  ;;  %1296 = vmatprep.subr.bf16.mxu1 %v1295_v55 }
 0x28c   :  { %1298 = vmatpush1.bf16.msra.mxu1 %v1297_v57  ;;  %749 = vmatprep.mubr.f32.mxu1 %v2734_v25 }
 0x28f   :  { %1206 = vmatmul.mubr.msk.f32.vlgmr.msra.gmra.mrb[0].mxu1 %vm583_vm9, %v573_v47 }
 0x290   :  { %755 = vmatprep.mubr.f32.mxu1 %v2734_v25 }
 0x293   :  { %1207 = vmatmul.mubr.msk.f32.gmra.mrb[2].mxu1 %vm583_vm9, %v576_v23 }
 0x294   :  { %761 = vmatprep.mubr.f32.mxu1 %v2734_v25 }
 0x297   :  { %1208 = vmatmul.mubr.msk.f32.gmra.mrb[4].mxu1 %vm583_vm9, %v579_v39 }
 0x298   :  { %767 = vmatprep.mubr.f32.mxu1 %v2734_v25 }
 0x29b   :  { %1209 = vmatmul.mubr.msk.f32.gmra.mrb[6].mxu1 %vm583_vm9, %v582_v5 }
 0x362   :  { %v751_v14 = vpop.f32.mrb[0].mxu1 }
 0x363   :  { %v774_v12 = vmax.f32 %v751_v14, 0.0  ;;  %v753_v21 = vpop.f32.mrb[1].mxu1 }
 0x365   :  { %v2202_v53 = vadd.f32 %v774_v12, %v1673_v24 }
 0x366   :  { %v757_v28 = vpop.f32.mrb[2].mxu1 }
 0x367   :  { %v776_v33 = vmax.f32 %v757_v28, 0.0  ;;  %790 = vrot.lane.b32.xlu0 %v2202_v53, %s1465_s18  ;;  %v759_v26 = vpop.f32.mrb[3].mxu1 }
 0x368   :  { %v777_v57 = vmax.f32 %v759_v26, 0.0 }
 0x369   :  { %v2207_v40 = vadd.f32 %v776_v33, %v1677_v31  ;;  %v775_v31 = vmax.f32 %v753_v21, 0.0 }
 0x36a   :  { %v763_v13 = vpop.f32.mrb[4].mxu1  ;;  %v2233_v55 = vadd.f32 %v777_v57, %v1701_v38 }
 0x36b   :  { %822 = vrot.lane.b32.xlu0 %v2202_v53, %s1461_s26  ;;  %792 = vrot.lane.b32.xlu1 %v2207_v40, %s1465_s18  ;;  %v765_v58 = vpop.f32.mrb[5].mxu1  ;;  %v2226_v16 = vadd.f32 %v775_v31, %v1695_v37  ;;  %v778_v37 = vmax.f32 %v763_v13, 0.0 }
 0x36d   :  { %v2252_v38 = vadd.f32 %v778_v37, %v1711_v41  ;;  %v779_v41 = vmax.f32 %v765_v58, 0.0 }
 0x36e   :  { %v769_v60 = vpop.f32.mrb[6].mxu1 }
 0x36f   :  { %854 = vrot.lane.b32.xlu0 %v2202_v53, %s1466_s3  ;;  %824 = vrot.lane.b32.xlu1 %v2207_v40, %s1461_s26  ;;  %v771_v24 = vpop.f32.mrb[7].mxu1  ;;  %v780_v47 = vmax.f32 %v769_v60, 0.0 }
 0x370   :  { %v781_v39 = vmax.f32 %v771_v24, 0.0 }
 0x371   :  { %v2259_v23 = vadd.f32 %v780_v47, %v1721_v42  ;;  %v2278_v42 = vadd.f32 %v779_v41, %v1735_v43 }
 0x372   :  { %v2285_v5 = vadd.f32 %v781_v39, %v1741_v44  ;;  %v1047_v44 = vld [vmem:[#allocation4 + $0x68] sm:$0xff] }
 0x373   :  { %886 = vrot.lane.b32.xlu0 %v2202_v53, %s1467_s21  ;;  %856 = vrot.lane.b32.xlu1 %v2207_v40, %s1466_s3 }
 0x374   :  { %1116 = vmatprep.mubr.f32.mxu0 %v1047_v44  ;;  %v1395_v44 = vld [vmem:[#allocation2] sm:$0xff] }
 0x377   :  { %918 = vrot.lane.b32.xlu0 %v2202_v53, %s1468_s0  ;;  %888 = vrot.lane.b32.xlu1 %v2207_v40, %s1467_s21 }
 0x37b   :  { %798 = vrot.lane.b32.xlu0 %v2226_v16, %s1465_s18  ;;  %920 = vrot.lane.b32.xlu1 %v2207_v40, %s1468_s0 }
 0x37f   :  { %830 = vrot.lane.b32.xlu0 %v2226_v16, %s1461_s26  ;;  %800 = vrot.lane.b32.xlu1 %v2233_v55, %s1465_s18 }
 0x383   :  { %862 = vrot.lane.b32.xlu0 %v2226_v16, %s1466_s3  ;;  %832 = vrot.lane.b32.xlu1 %v2233_v55, %s1461_s26 }
 0x387   :  { %894 = vrot.lane.b32.xlu0 %v2226_v16, %s1467_s21  ;;  %864 = vrot.lane.b32.xlu1 %v2233_v55, %s1466_s3 }
 0x38b   :  { %926 = vrot.lane.b32.xlu0 %v2226_v16, %s1468_s0  ;;  %896 = vrot.lane.b32.xlu1 %v2233_v55, %s1467_s21 }
 0x38f   :  { %928 = vrot.lane.b32.xlu1 %v2233_v55, %s1468_s0  ;;  %794 = vrot.lane.b32.xlu0 %v2252_v38, %s1465_s18 }
 0x393   :  { %826 = vrot.lane.b32.xlu0 %v2252_v38, %s1461_s26  ;;  %796 = vrot.lane.b32.xlu1 %v2259_v23, %s1465_s18 }
 0x397   :  { %858 = vrot.lane.b32.xlu0 %v2252_v38, %s1466_s3  ;;  %828 = vrot.lane.b32.xlu1 %v2259_v23, %s1461_s26 }
 0x39b   :  { %890 = vrot.lane.b32.xlu0 %v2252_v38, %s1467_s21  ;;  %860 = vrot.lane.b32.xlu1 %v2259_v23, %s1466_s3 }
 0x39f   :  { %922 = vrot.lane.b32.xlu0 %v2252_v38, %s1468_s0  ;;  %892 = vrot.lane.b32.xlu1 %v2259_v23, %s1467_s21 }
 0x3a3   :  { %802 = vrot.lane.b32.xlu0 %v2278_v42, %s1465_s18  ;;  %924 = vrot.lane.b32.xlu1 %v2259_v23, %s1468_s0 }
 0x3a7   :  { %950 = vrot.lane.b32.xlu0 %v2202_v53, %s1469_s22  ;;  %804 = vrot.lane.b32.xlu1 %v2285_v5, %s1465_s18 }
 0x3ab   :  { %834 = vrot.lane.b32.xlu0 %v2278_v42, %s1461_s26  ;;  %952 = vrot.lane.b32.xlu1 %v2207_v40, %s1469_s22 }
 0x3af   :  { %866 = vrot.lane.b32.xlu0 %v2278_v42, %s1466_s3  ;;  %836 = vrot.lane.b32.xlu1 %v2285_v5, %s1461_s26 }
 0x3b3   :  { %898 = vrot.lane.b32.xlu0 %v2278_v42, %s1467_s21  ;;  %960 = vrot.lane.b32.xlu1 %v2233_v55, %s1469_s22 }
 0x3b7   :  { %930 = vrot.lane.b32.xlu0 %v2278_v42, %s1468_s0  ;;  %868 = vrot.lane.b32.xlu1 %v2285_v5, %s1466_s3 }
 0x3bb   :  { %958 = vrot.lane.b32.xlu0 %v2226_v16, %s1469_s22  ;;  %956 = vrot.lane.b32.xlu1 %v2259_v23, %s1469_s22 }
 0x3bf   :  { %954 = vrot.lane.b32.xlu0 %v2252_v38, %s1469_s22  ;;  %900 = vrot.lane.b32.xlu1 %v2285_v5, %s1467_s21 }
 0x3c3   :  { %962 = vrot.lane.b32.xlu0 %v2278_v42, %s1469_s22  ;;  %984 = vrot.lane.b32.xlu1 %v2207_v40, %s1471_s23 }
 0x3c7   :  { %982 = vrot.lane.b32.xlu0 %v2202_v53, %s1471_s23  ;;  %992 = vrot.lane.b32.xlu1 %v2233_v55, %s1471_s23 }
 0x3cb   :  { %990 = vrot.lane.b32.xlu0 %v2226_v16, %s1471_s23  ;;  %988 = vrot.lane.b32.xlu1 %v2259_v23, %s1471_s23 }
 0x3cf   :  { %986 = vrot.lane.b32.xlu0 %v2252_v38, %s1471_s23  ;;  %932 = vrot.lane.b32.xlu1 %v2285_v5, %s1468_s0 }
 0x3d3   :  { %994 = vrot.lane.b32.xlu0 %v2278_v42, %s1471_s23  ;;  %1016 = vrot.lane.b32.xlu1 %v2207_v40, %s1472_s24 }
 0x3d7   :  { %1014 = vrot.lane.b32.xlu0 %v2202_v53, %s1472_s24  ;;  %964 = vrot.lane.b32.xlu1 %v2285_v5, %s1469_s22 }
 0x3d9   :  { %v791_v43 = vpop.permute.xlu0 %790 }
 0x3db   :  { %1022 = vrot.lane.b32.xlu0 %v2226_v16, %s1472_s24  ;;  %1024 = vrot.lane.b32.xlu1 %v2233_v55, %s1472_s24 }
 0x3dd   :  { %v2343_v14 = vpop.permute.xlu0 %822  ;;  %v793_v12 = vpop.permute.xlu1 %792 }
 0x3df   :  { %1018 = vrot.lane.b32.xlu0 %v2252_v38, %s1472_s24  ;;  %996 = vrot.lane.b32.xlu1 %v2285_v5, %s1471_s23 }
 0x3e1   :  { %v2349_v21 = vpop.permute.xlu0 %854  ;;  %v2351_v28 = vpop.permute.xlu1 %824 }
 0x3e3   :  { %1026 = vrot.lane.b32.xlu0 %v2278_v42, %s1472_s24  ;;  %1020 = vrot.lane.b32.xlu1 %v2259_v23, %s1472_s24 }
 0x3e5   :  { %v887_v33 = vpop.permute.xlu0 %886  ;;  %v2357_v26 = vpop.permute.xlu1 %856 }
 0x3e7   :  { %1028 = vrot.lane.b32.xlu1 %v2285_v5, %s1472_s24 }
 0x3e9   :  { %v919_v13 = vpop.permute.xlu0 %918  ;;  %v889_v58 = vpop.permute.xlu1 %888 }
 0x3ed   :  { %v799_v60 = vpop.permute.xlu0 %798  ;;  %v921_v24 = vpop.permute.xlu1 %920 }
 0x3ee   :  { %v806_v31 = vsel %vm53_vm1, %v791_v43, %v799_v60  ;;  %v810_v57 = vsel %vm53_vm1, %v799_v60, %v791_v43 }
 0x3ef   :  { %v814_v25 = vmul.f32 %v1395_v44, %v810_v57  ;;  %v815_v1 = vmul.f32 %v1396_v34, %v806_v31 }
 0x3f1   :  { %v2365_v37 = vpop.permute.xlu0 %830  ;;  %v801_v47 = vpop.permute.xlu1 %800 }
 0x3f2   :  { %v807_v41 = vsel %vm53_vm1, %v793_v12, %v801_v47  ;;  %v811_v39 = vsel %vm53_vm1, %v801_v47, %v793_v12  ;;  %v838_v34 = vsel %vm64_vm0, %v2343_v14, %v2365_v37 }
 0x3f3   :  { %v816_v56 = vmul.f32 %v811_v39, %v2735_v36  ;;  %v817_v54 = vmul.f32 %v807_v41, %v2736_v52  ;;  %v1398_v41 = vld [vmem:[#allocation2 + $0xc0] sm:$0xff]  ;;  %v1399_v39 = vld [vmem:[#allocation2 + $0xc8] sm:$0xff] }
 0x3f5   :  { %v1301_v46 = vpack.c.bf16 %v816_v56, %v814_v25  ;;  %v2373_v32 = vpop.permute.xlu0 %862  ;;  %v833_v43 = vpop.permute.xlu1 %832  ;;  %v1299_v60 = vpack.c.bf16 %v817_v54, %v815_v1  ;;  %v1397_v56 = vld [vmem:[#allocation2 + $0x80] sm:$0xff] }
 0x3f6   :  { %v874_v11 = vsel %vm75_vm2, %v2373_v32, %v2349_v21  ;;  %v843_v9 = vsel %vm64_vm0, %v833_v43, %v2351_v28 }
 0x3f7   :  { %1300 = vmatprep.subr.bf16.mxu0 %v1299_v60  ;;  %v2385_v52 = vmul.f32 %v1397_v56, %v874_v11 }
 0x3f8   :  { %1302 = vmatpush1.bf16.msra.mxu0 %v1301_v46 }
 0x3f9   :  { %v895_v12 = vpop.permute.xlu0 %894  ;;  %v2379_v57 = vpop.permute.xlu1 %864 }
 0x3fa   :  { %v875_v36 = vsel %vm75_vm2, %v2379_v57, %v2357_v26  ;;  %v902_v1 = vsel %vm86_vm3, %v887_v33, %v895_v12  ;;  %v906_v46 = vsel %vm86_vm3, %v895_v12, %v887_v33 }
 0x3fb   :  { %v2388_v54 = vmul.f32 %v875_v36, %v1924_v35  ;;  %v2400_v35 = vmul.f32 %v1398_v41, %v906_v46  ;;  %v2402_v44 = vmul.f32 %v1399_v39, %v902_v1 }
 0x3fd   :  { %v927_v25 = vpop.permute.xlu0 %926  ;;  %v897_v31 = vpop.permute.xlu1 %896 }
 0x3fe   :  { %v903_v47 = vsel %vm86_vm3, %v889_v58, %v897_v31  ;;  %v907_v11 = vsel %vm86_vm3, %v897_v31, %v889_v58  ;;  %v934_v12 = vsel %vm97_vm4, %v919_v13, %v927_v25  ;;  %v938_v36 = vsel %vm97_vm4, %v927_v25, %v919_v13  ;;  %v1400_v31 = vld [vmem:[#allocation2 + $0x140] sm:$0xff] }
 0x3ff   :  { %v2405_v60 = vmul.f32 %v907_v11, %v1984_v22  ;;  %v2408_v33 = vmul.f32 %v903_v47, %v1947_v18  ;;  %v2422_v47 = vmul.f32 %v1400_v31, %v934_v12  ;;  %v1401_v11 = vld [vmem:[#allocation2 + $0x148] sm:$0xff] }
 0x400   :  { %v2424_v41 = vmul.f32 %v1401_v11, %v938_v36 }
 0x401   :  { %v929_v56 = vpop.permute.xlu1 %928  ;;  %v795_v46 = vpop.permute.xlu0 %794  ;;  %2737 = vst [vmem:[#allocation10_spill] sm:$0xff] %v2422_v47 }
 0x402   :  { %v935_v22 = vsel %vm97_vm4, %v921_v24, %v929_v56  ;;  %v939_v18 = vsel %vm97_vm4, %v929_v56, %v921_v24 }
 0x403   :  { %v2427_v13 = vmul.f32 %v935_v22, %v2037_v30  ;;  %v2430_v25 = vmul.f32 %v939_v18, %v2025_v7  ;;  %v839_v18 = vsel %vm64_vm0, %v2351_v28, %v833_v43  ;;  %v842_v28 = vsel %vm64_vm0, %v2365_v37, %v2343_v14 }
 0x404   :  { %v849_v45 = vmul.f32 %v839_v18, %v2740_v62  ;;  %v1402_v62 = vld [vmem:[#allocation2 + $0x48] sm:$0xff] }
 0x405   :  { %2738 = vst [vmem:[#allocation9_spill] sm:$0xff] %v2427_v13  ;;  %v827_v58 = vpop.permute.xlu0 %826  ;;  %v797_v1 = vpop.permute.xlu1 %796  ;;  %v847_v43 = vmul.f32 %v1402_v62, %v838_v34 }
 0x409   :  { %v859_v56 = vpop.permute.xlu0 %858  ;;  %v829_v12 = vpop.permute.xlu1 %828 }
 0x40d   :  { %v2436_v31 = vpop.permute.xlu0 %890  ;;  %v2438_v36 = vpop.permute.xlu1 %860 }
 0x411   :  { %v2440_v11 = vpop.permute.xlu0 %922  ;;  %v2442_v30 = vpop.permute.xlu1 %892 }
 0x415   :  { %v803_v7 = vpop.permute.xlu0 %802  ;;  %v2444_v22 = vpop.permute.xlu1 %924 }
 0x416   :  { %2739 = vst [vmem:[#allocation37_spill] sm:$0xff] %v2444_v22  ;;  %v808_v39 = vsel %vm53_vm1, %v795_v46, %v803_v7  ;;  %v812_v24 = vsel %vm53_vm1, %v803_v7, %v795_v46 }
 0x417   :  { %v818_v7 = vmul.f32 %v812_v24, %v1865_v48  ;;  %v819_v47 = vmul.f32 %v808_v39, %v1867_v59  ;;  %v848_v48 = vmul.f32 %v843_v9, %v1882_v15  ;;  %v871_v59 = vsel %vm75_vm2, %v2357_v26, %v2379_v57 }
 0x418   :  { %v870_v15 = vsel %vm75_vm2, %v2349_v21, %v2373_v32  ;;  %v1404_v21 = vld [vmem:[#allocation2 + $0x88] sm:$0xff] }
 0x419   :  { %v2457_v2 = vpop.permute.xlu0 %950  ;;  %v805_v50 = vpop.permute.xlu1 %804 }
 0x41a   :  { %v809_v51 = vsel %vm53_vm1, %v797_v1, %v805_v50  ;;  %v813_v46 = vsel %vm53_vm1, %v805_v50, %v797_v1 }
 0x41b   :  { %v820_v13 = vmul.f32 %v813_v46, %v1873_v3  ;;  %v821_v20 = vmul.f32 %v809_v51, %v1875_v6  ;;  %v1307_v3 = vpack.c.bf16 %v849_v45, %v847_v43  ;;  %v1403_v6 = vld [vmem:[#allocation2 + $0x40] sm:$0xff]  ;;  %v881_v45 = vmul.f32 %v871_v59, %v1903_v61 }
 0x41c   :  { %v846_v51 = vmul.f32 %v1403_v6, %v842_v28 }
 0x41d   :  { %v1305_v18 = vpack.c.bf16 %v820_v13, %v818_v7  ;;  %v835_v29 = vpop.permute.xlu0 %834  ;;  %v2475_v22 = vpop.permute.xlu1 %952  ;;  %v1303_v50 = vpack.c.bf16 %v821_v20, %v819_v47  ;;  %v879_v47 = vmul.f32 %v1404_v21, %v870_v15 }
 0x41e   :  { %v840_v14 = vsel %vm64_vm0, %v827_v58, %v835_v29  ;;  %v844_v37 = vsel %vm64_vm0, %v835_v29, %v827_v58  ;;  %v1309_v26 = vpack.c.bf16 %v848_v48, %v846_v51 }
 0x41f   :  { %1304 = vmatprep.subr.bf16.mxu0 %v1303_v50  ;;  %v850_v29 = vmul.f32 %v844_v37, %v1908_v27  ;;  %v851_v58 = vmul.f32 %v840_v14, %v1910_v8  ;;  %v1315_v46 = vpack.c.bf16 %v881_v45, %v879_v47  ;;  %v2742_v50 = vpack.c.bf16 %v2388_v54, %v2385_v52  ;;  %v2744_v37 = vld [vmem:[#allocation13_spill] sm:$0xff] }
 0x420   :  { %1306 = vmatpush1.bf16.msra.mxu0 %v1305_v18  ;;  %v2741_v18 = vld [vmem:[#allocation12_spill] sm:$0xff]  ;;  %v2743_v52 = vpack.c.bf16 %v2408_v33, %v2402_v44  ;;  %v2747_v44 = vpack.c.bf16 %v2405_v60, %v2400_v35  ;;  %v1335_v35 = vpack.c.bf16 %v2285_v5, %v2278_v42  ;;  %v2750_v47 = vld [vmem:[#allocation37_spill] sm:$0xff] }
 0x421   :  { %v867_v20 = vpop.permute.xlu0 %866  ;;  %1308 = vmatprep.subr.bf16.mxu0 %v1307_v3  ;;  %v837_v9 = vpop.permute.xlu1 %836  ;;  %v2749_v5 = vld [vmem:[#allocation16_spill] sm:$0xff] }
 0x422   :  { %v841_v57 = vsel %vm64_vm0, %v829_v12, %v837_v9  ;;  %v845_v34 = vsel %vm64_vm0, %v837_v9, %v829_v12  ;;  %v872_v12 = vsel %vm75_vm2, %v859_v56, %v867_v20  ;;  %v876_v27 = vsel %vm75_vm2, %v867_v20, %v859_v56  ;;  %v2746_v9 = vld [vmem:[#allocation15_spill] sm:$0xff] }
 0x423   :  { %v852_v1 = vmul.f32 %v845_v34, %v1916_v10  ;;  %v853_v32 = vmul.f32 %v841_v57, %v1918_v63  ;;  %v882_v28 = vmul.f32 %v876_v27, %v1953_v49  ;;  %v883_v62 = vmul.f32 %v872_v12, %v1955_v17  ;;  %v1405_v12 = vld [vmem:[#allocation2 + $0x188] sm:$0xff] }
 0x424   :  { %1310 = vmatpush1.bf16.msra.mxu0 %v1309_v26 }
 0x425   :  { %v1313_v13 = vpack.c.bf16 %v852_v1, %v850_v29  ;;  %v899_v39 = vpop.permute.xlu0 %898  ;;  %v2499_v61 = vpop.permute.xlu1 %960  ;;  %v1311_v24 = vpack.c.bf16 %v853_v32, %v851_v58  ;;  %v1333_v58 = vpack.c.bf16 %v2207_v40, %v2202_v53  ;;  %v1337_v32 = vpack.c.bf16 %v2259_v23, %v2252_v38 }
 0x426   :  { %v904_v49 = vsel %vm86_vm3, %v2436_v31, %v899_v39  ;;  %v908_v17 = vsel %vm86_vm3, %v899_v39, %v2436_v31  ;;  %v2745_v31 = vld [vmem:[#allocation14_spill] sm:$0xff]  ;;  %v971_v40 = vsel %vm108_vm5, %v2499_v61, %v2475_v22  ;;  %v2748_v23 = vpack.c.bf16 %v2430_v25, %v2424_v41  ;;  %v2752_v41 = vld [vmem:[#allocation19_spill] sm:$0xff] }
 0x427   :  { %1312 = vmatprep.subr.bf16.mxu0 %v1311_v24  ;;  %v914_v14 = vmul.f32 %v908_v17, %v1998_v0  ;;  %v915_v15 = vmul.f32 %v904_v49, %v2744_v37  ;;  %v2751_v24 = vld [vmem:[#allocation17_spill] sm:$0xff] }
 0x428   :  { %1314 = vmatpush1.bf16.msra.mxu0 %v1313_v13  ;;  %v2758_v17 = vld [vmem:[#allocation21_spill] sm:$0xff] }
 0x429   :  { %v931_v8 = vpop.permute.xlu0 %930  ;;  %1316 = vmatprep.subr.bf16.mxu0 %v1315_v46  ;;  %v869_v10 = vpop.permute.xlu1 %868 }
 0x42a   :  { %v873_v63 = vsel %vm75_vm2, %v2438_v36, %v869_v10  ;;  %v877_v7 = vsel %vm75_vm2, %v869_v10, %v2438_v36 }
 0x42b   :  { %v884_v43 = vmul.f32 %v877_v7, %v1963_v19  ;;  %v885_v56 = vmul.f32 %v873_v63, %v2741_v18  ;;  %v2754_v63 = vld [vmem:[#allocation9_spill] sm:$0xff]  ;;  %v2755_v7 = vld [vmem:[#allocation10_spill] sm:$0xff] }
 0x42c   :  { %1318 = vmatpush1.bf16.msra.mxu0 %v2742_v50  ;;  %v1406_v18 = vld [vmem:[#allocation2 + $0x180] sm:$0xff] }
 0x42d   :  { %v1321_v48 = vpack.c.bf16 %v884_v43, %v882_v28  ;;  %v959_v59 = vpop.permute.xlu0 %958  ;;  %v2518_v3 = vpop.permute.xlu1 %956  ;;  %v1319_v6 = vpack.c.bf16 %v885_v56, %v883_v62  ;;  %v2756_v28 = vpack.c.bf16 %v2754_v63, %v2755_v7  ;;  %v2757_v62 = vld [vmem:[#allocation18_spill] sm:$0xff]  ;;  %v2767_v7 = vld [vmem:[#allocation33_spill] sm:$0xff] }
 0x42e   :  { %v970_v53 = vsel %vm108_vm5, %v959_v59, %v2457_v2  ;;  %v977_v43 = vmul.f32 %v971_v40, %v2757_v62  ;;  %v2768_v62 = vld [vmem:[#allocation30_spill] sm:$0xff] }
 0x42f   :  { %1320 = vmatprep.subr.bf16.mxu0 %v1319_v6  ;;  %v975_v27 = vmul.f32 %v1405_v12, %v970_v53 }
 0x430   :  { %1322 = vmatpush1.bf16.msra.mxu0 %v1321_v48 }
 0x431   :  { %v955_v19 = vpop.permute.xlu0 %954  ;;  %1324 = vmatprep.subr.bf16.mxu0 %v2743_v52  ;;  %v901_v54 = vpop.permute.xlu1 %900 }
 0x432   :  { %v905_v36 = vsel %vm86_vm3, %v2442_v30, %v901_v54  ;;  %v909_v51 = vsel %vm86_vm3, %v901_v54, %v2442_v30  ;;  %v1331_v30 = vpack.c.bf16 %v2233_v55, %v2226_v16  ;;  %v936_v16 = vsel %vm97_vm4, %v2440_v11, %v931_v8 }
 0x433   :  { %v916_v20 = vmul.f32 %v909_v51, %v2745_v31  ;;  %v917_v26 = vmul.f32 %v905_v36, %v2746_v9  ;;  %v940_v55 = vsel %vm97_vm4, %v931_v8, %v2440_v11  ;;  %v946_v21 = vmul.f32 %v936_v16, %v2749_v5  ;;  %v2753_v8 = vld [vmem:[#allocation20_spill] sm:$0xff]  ;;  %v2759_v51 = vld [vmem:[#allocation22_spill] sm:$0xff]  ;;  %v1408_v16 = vld [vmem:[#allocation2 + $0x1c0] sm:$0xff] }
 0x434   :  { %1326 = vmatpush1.bf16.msra.mxu0 %v2747_v44  ;;  %v966_v11 = vsel %vm108_vm5, %v2457_v2, %v959_v59  ;;  %v947_v46 = vmul.f32 %v940_v55, %v2751_v24  ;;  %v967_v2 = vsel %vm108_vm5, %v2475_v22, %v2499_v61  ;;  %v1347_v54 = vpack.c.bf16 %v977_v43, %v975_v27 }
 0x435   :  { %v1329_v33 = vpack.c.bf16 %v916_v20, %v914_v14  ;;  %v963_v45 = vpop.permute.xlu0 %962  ;;  %v2542_v57 = vpop.permute.xlu1 %984  ;;  %v1327_v34 = vpack.c.bf16 %v917_v26, %v915_v15  ;;  %v974_v56 = vmul.f32 %v1406_v18, %v966_v11  ;;  %v976_v52 = vmul.f32 %v967_v2, %v2758_v17  ;;  %v2760_v26 = vld [vmem:[#allocation23_spill] sm:$0xff]  ;;  %v1409_v2 = vld [vmem:[#allocation2 + $0x208] sm:$0xff] }
 0x436   :  { %v968_v49 = vsel %vm108_vm5, %v955_v19, %v963_v45  ;;  %v972_v22 = vsel %vm108_vm5, %v963_v45, %v955_v19  ;;  %v2769_v18 = vld [vmem:[#allocation31_spill] sm:$0xff] }
 0x437   :  { %1328 = vmatprep.subr.bf16.mxu0 %v1327_v34  ;;  %v1349_v36 = vpack.c.bf16 %v976_v52, %v974_v56  ;;  %v978_v14 = vmul.f32 %v968_v49, %v2759_v51  ;;  %v979_v44 = vmul.f32 %v972_v22, %v2760_v26  ;;  %v2761_v34 = vld [vmem:[#allocation25_spill] sm:$0xff]  ;;  %v2770_v52 = vld [vmem:[#allocation32_spill] sm:$0xff]  ;;  %v2773_v26 = vld [vmem:[#allocation35_spill] sm:$0xff] }
 0x438   :  { %1330 = vmatpush1.bf16.msra.mxu0 %v1329_v33  ;;  %v1407_v33 = vld [vmem:[#allocation2 + $0x1c8] sm:$0xff]  ;;  %v1410_v49 = vld [vmem:[#allocation2 + $0x200] sm:$0xff] }
 0x439   :  { %v983_v0 = vpop.permute.xlu0 %982  ;;  %1332 = vmatprep.subr.bf16.mxu0 %v1331_v30  ;;  %v993_v29 = vpop.permute.xlu1 %992 }
 0x43a   :  { %v1003_v31 = vsel %vm119_vm6, %v993_v29, %v2542_v57 }
 0x43c   :  { %1334 = vmatpush1.bf16.msra.mxu0 %v1333_v58  ;;  %v2762_v58 = vld [vmem:[#allocation26_spill] sm:$0xff] }
 0x43d   :  { %v991_v60 = vpop.permute.xlu0 %990  ;;  %v2550_v1 = vpop.permute.xlu1 %988  ;;  %1336 = vmatprep.subr.bf16.mxu0 %v1335_v35 }
 0x43e   :  { %v1002_v61 = vsel %vm119_vm6, %v991_v60, %v983_v0  ;;  %v998_v20 = vsel %vm119_vm6, %v983_v0, %v991_v60  ;;  %v999_v0 = vsel %vm119_vm6, %v2542_v57, %v993_v29  ;;  %v2763_v60 = vld [vmem:[#allocation24_spill] sm:$0xff] }
 0x43f   :  { %v1007_v45 = vmul.f32 %v1407_v33, %v1002_v61  ;;  %v1006_v55 = vmul.f32 %v1408_v16, %v998_v20  ;;  %v2774_v33 = vld [vmem:[#allocation36_spill] sm:$0xff] }
 0x440   :  { %1338 = vmatpush1.bf16.msra.mxu0 %v1337_v32  ;;  %v1009_v32 = vmul.f32 %v1003_v31, %v2763_v60  ;;  %v2771_v31 = vld [vmem:[#allocation8_spill] sm:$0xff] }
 0x441   :  { %v987_v42 = vpop.permute.xlu0 %986  ;;  %v933_v38 = vpop.permute.xlu1 %932  ;;  %1340 = vmatprep.subr.bf16.mxu0 %v2748_v23 }
 0x442   :  { %v937_v13 = vsel %vm97_vm4, %v2750_v47, %v933_v38  ;;  %v941_v39 = vsel %vm97_vm4, %v933_v38, %v2750_v47  ;;  %v1355_v47 = vpack.c.bf16 %v1009_v32, %v1007_v45 }
 0x443   :  { %v948_v25 = vmul.f32 %v937_v13, %v2752_v41  ;;  %v949_v10 = vmul.f32 %v941_v39, %v2753_v8  ;;  %v2765_v39 = vld [vmem:[#allocation28_spill] sm:$0xff] }
 0x444   :  { %1342 = vmatpush1.bf16.msra.mxu0 %v2756_v28 }
 0x445   :  { %v1345_v50 = vpack.c.bf16 %v948_v25, %v946_v21  ;;  %v995_v48 = vpop.permute.xlu0 %994  ;;  %v1017_v59 = vpop.permute.xlu1 %1016  ;;  %v1343_v6 = vpack.c.bf16 %v949_v10, %v947_v46  ;;  %v2764_v21 = vld [vmem:[#allocation27_spill] sm:$0xff]  ;;  %v2766_v46 = vld [vmem:[#allocation29_spill] sm:$0xff] }
 0x446   :  { %v1000_v23 = vsel %vm119_vm6, %v987_v42, %v995_v48  ;;  %v1004_v5 = vsel %vm119_vm6, %v995_v48, %v987_v42  ;;  %v1008_v11 = vmul.f32 %v999_v0, %v2764_v21 }
 0x447   :  { %1344 = vmatprep.subr.bf16.mxu0 %v1343_v6  ;;  %v1010_v24 = vmul.f32 %v1000_v23, %v2765_v39  ;;  %v1011_v12 = vmul.f32 %v1004_v5, %v2766_v46 }
 0x448   :  { %1346 = vmatpush1.bf16.msra.mxu0 %v1345_v50  ;;  %v1357_v13 = vpack.c.bf16 %v1008_v11, %v1006_v55 }
 0x449   :  { %v1015_v37 = vpop.permute.xlu0 %1014  ;;  %v965_v15 = vpop.permute.xlu1 %964  ;;  %1348 = vmatprep.subr.bf16.mxu0 %v1347_v54 }
 0x44a   :  { %v969_v19 = vsel %vm108_vm5, %v2518_v3, %v965_v15  ;;  %v973_v9 = vsel %vm108_vm5, %v965_v15, %v2518_v3 }
 0x44b   :  { %v980_v30 = vmul.f32 %v969_v19, %v2761_v34  ;;  %v981_v35 = vmul.f32 %v973_v9, %v2762_v58  ;;  %v2772_v19 = vld [vmem:[#allocation34_spill] sm:$0xff]  ;;  %v2775_v34 = vmov 0.0  }
 0x44c   :  { %1350 = vmatpush1.bf16.msra.mxu0 %v1349_v36  ;;  %v1046_v36 = vld [vmem:[#allocation4 + $0x60] sm:$0xff] }
 0x44d   :  { %v1353_v53 = vpack.c.bf16 %v980_v30, %v978_v14  ;;  %v1023_v40 = vpop.permute.xlu0 %1022  ;;  %v1025_v3 = vpop.permute.xlu1 %1024  ;;  %v1351_v38 = vpack.c.bf16 %v981_v35, %v979_v44  ;;  %v1048_v35 = vld [vmem:[#allocation4 + $0x70] sm:$0xff] }
 0x44e   :  { %v1034_v57 = vsel %vm130_vm7, %v1023_v40, %v1015_v37  ;;  %v1035_v29 = vsel %vm130_vm7, %v1025_v3, %v1017_v59  ;;  %v1030_v42 = vsel %vm130_vm7, %v1015_v37, %v1023_v40  ;;  %v1031_v25 = vsel %vm130_vm7, %v1017_v59, %v1025_v3 }
 0x44f   :  { %1352 = vmatprep.subr.bf16.mxu0 %v1351_v38  ;;  %v1039_v63 = vmul.f32 %v1409_v2, %v1034_v57  ;;  %v1041_v28 = vmul.f32 %v1035_v29, %v2767_v7  ;;  %v1038_v17 = vmul.f32 %v1410_v49, %v1030_v42  ;;  %v1040_v54 = vmul.f32 %v1031_v25, %v2770_v52 }
 0x450   :  { %1354 = vmatpush1.bf16.msra.mxu0 %v1353_v53 }
 0x451   :  { %v1019_v27 = vpop.permute.xlu0 %1018  ;;  %v997_v41 = vpop.permute.xlu1 %996  ;;  %1356 = vmatprep.subr.bf16.mxu0 %v1355_v47  ;;  %v1363_v22 = vpack.c.bf16 %v1041_v28, %v1039_v63  ;;  %v1365_v14 = vpack.c.bf16 %v1040_v54, %v1038_v17 }
 0x452   :  { %v1001_v8 = vsel %vm119_vm6, %v2550_v1, %v997_v41  ;;  %v1005_v10 = vsel %vm119_vm6, %v997_v41, %v2550_v1 }
 0x453   :  { %v1012_v43 = vmul.f32 %v1001_v8, %v2768_v62  ;;  %v1013_v56 = vmul.f32 %v1005_v10, %v2769_v18 }
 0x454   :  { %1358 = vmatpush1.bf16.msra.mxu0 %v1357_v13 }
 0x455   :  { %v1361_v50 = vpack.c.bf16 %v1012_v43, %v1010_v24  ;;  %v1027_v48 = vpop.permute.xlu0 %1026  ;;  %v1021_v59 = vpop.permute.xlu1 %1020  ;;  %v1359_v6 = vpack.c.bf16 %v1013_v56, %v1011_v12 }
 0x456   :  { %v1032_v1 = vsel %vm130_vm7, %v1019_v27, %v1027_v48  ;;  %v1036_v61 = vsel %vm130_vm7, %v1027_v48, %v1019_v27 }
 0x457   :  { %1360 = vmatprep.subr.bf16.mxu0 %v1359_v6  ;;  %v1042_v20 = vmul.f32 %v1032_v1, %v2771_v31  ;;  %v1043_v9 = vmul.f32 %v1036_v61, %v2772_v19 }
 0x458   :  { %1362 = vmatpush1.bf16.msra.mxu0 %v1361_v50 }
 0x459   :  { %v1029_v51 = vpop.permute.xlu1 %1028  ;;  %1364 = vmatprep.subr.bf16.mxu0 %v1363_v22 }
 0x45a   :  { %v1033_v37 = vsel %vm130_vm7, %v1021_v59, %v1029_v51  ;;  %v1037_v15 = vsel %vm130_vm7, %v1029_v51, %v1021_v59 }
 0x45b   :  { %v1044_v44 = vmul.f32 %v1033_v37, %v2773_v26  ;;  %v1045_v45 = vmul.f32 %v1037_v15, %v2774_v33  ;;  %1117 = vmatmul.mubr.f32.vlgmr.msra.gmra.mrb[8].mxu0 %v1046_v36 }
 0x45c   :  { %1366 = vmatpush1.bf16.msra.mxu0 %v1365_v14  ;;  %1187 = vmatprep.mubr.f32.mxu0 %v2775_v34 }
 0x45d   :  { %v1369_v30 = vpack.c.bf16 %v1044_v44, %v1042_v20  ;;  %v1367_v58 = vpack.c.bf16 %v1045_v45, %v1043_v9 }
 0x45f   :  { %1368 = vmatprep.subr.bf16.mxu0 %v1367_v58 }
 0x460   :  { %1370 = vmatpush1.bf16.msra.mxu0 %v1369_v30 }
 0x463   :  { %1210 = vmatmul.mubr.msk.f32.vlgmr.msra.gmra.mrb[8].mxu0 %vm583_vm9, %v1048_v35 }
 0x536   :  { %v1189_v4 = vpop.f32.mrb[8].mxu0 }
 0x537   :  { %1194 = vst [vmem:[%s2666_s4] sm:$0xff] %v1189_v4  ;;  %v1191_v0 = vpop.f32.mrb[9].mxu0 }
 0x538   :  { %1195 = vst [vmem:[%s2666_s4 + $0x8] sm:$0xff] %v1191_v0 }
 0x539   :  { %1200 = vsyncpa [#allocation3], 1 }
 0x53a   :  { %1201 = vsyncpa [#allocation5], 1 }

</bundles_post_ra>
